<compile_context>
chip_gen: v7x
topology: tpu7x:2x2x1
jax: 0.10.0
libtpu: 0.0.40
codegen_flags: <defaults>
</compile_context>

<pallas_src>
import functools

import jax
import jax.numpy as jnp
from jax import lax
from jax.experimental import pallas as pl
from jax.experimental.pallas import tpu as pltpu


def _round_up(x, m):
    return ((x + m - 1) // m) * m


def _dkt_kernel(layer_dim, T, TB, *refs):
    # Argument list depends on layer_dim: the w_ihr slab is only shipped when
    # there is more than one RNN layer.
    if layer_dim > 1:
        (x_ref,        # (T*TB, Din)        bf16, row index = t*TB + b
         w_pre_ref,    # (Din, E)           bf16
         b_pre_ref,    # (1, E)             f32
         w_pre2_ref,   # (E, E2)            bf16
         b_pre2_ref,   # (1, E2)            f32
         w_ih0_ref,    # (E2, H)            bf16   layer-0 input weights
         w_ihr_ref,    # (L-1, H, H)        bf16   layer>0 input weights
         b_rnn_ref,    # (L, 1, H)          f32    fused b_ih + b_hh
         w_hh_ref,     # (L, H, H)          bf16   recurrent weights
         w_fc_ref,     # (H, Dout_pad)      bf16
         b_fc_ref,     # (1, Dout_pad)      f32
         out_ref,      # (T*TB, Dout_pad)   bf16
         seq_scr,      # VMEM (T*TB, H) f32  proj, then layer output sequence
         ) = refs
    else:
        (x_ref, w_pre_ref, b_pre_ref, w_pre2_ref, b_pre2_ref,
         w_ih0_ref, b_rnn_ref, w_hh_ref, w_fc_ref, b_fc_ref,
         out_ref, seq_scr) = refs
        w_ihr_ref = None

    H = seq_scr.shape[-1]

    # ---- embedding MLP: pre -> relu -> pre2, all T*TB tokens in two matmuls ----
    e1 = jnp.dot(x_ref[...], w_pre_ref[...],
                 preferred_element_type=jnp.float32) + b_pre_ref[...]
    e1 = jnp.maximum(e1, 0.0).astype(jnp.bfloat16)
    e2 = (jnp.dot(e1, w_pre2_ref[...],
                  preferred_element_type=jnp.float32) + b_pre2_ref[...]
          ).astype(jnp.bfloat16)

    # ---- stacked tanh RNN (h0 = 0), sequential over time ----
    # Unroll tuned against vreg pressure: full for short sequences, 8 for
    # moderate batch tiles, 4 once the live (TB, H) f32 state gets large.
    if T <= 32:
        unroll = True
    elif TB <= 64:
        unroll = 8
    else:
        unroll = 4

    for l in range(layer_dim):
        # Hoisted input projection + fused biases for ALL timesteps (one matmul),
        # so the serial loop only carries the h @ W_hh dependence.  The result
        # is written into seq_scr; each step overwrites its own row with h_t.
        if l == 0:
            proj = jnp.dot(e2, w_ih0_ref[...],
                           preferred_element_type=jnp.float32)
        else:
            proj = jnp.dot(seq_scr[...].astype(jnp.bfloat16), w_ihr_ref[l - 1],
                           preferred_element_type=jnp.float32)
        seq_scr[...] = proj + b_rnn_ref[l]

        w_hh = w_hh_ref[l]                      # (H, H) bf16, resident across steps

        def step(t, h, w_hh=w_hh):
            row = pl.multiple_of(t * TB, TB)    # sublane-aligned start
            pre = seq_scr[pl.ds(row, TB), :]    # read this step's projection
            # bf16 operands, f32 accumulation; carried h / add / tanh stay f32.
            h_new = jnp.tanh(pre + jnp.dot(h.astype(jnp.bfloat16), w_hh,
                                           preferred_element_type=jnp.float32))
            seq_scr[pl.ds(row, TB), :] = h_new  # overwrite row with hidden state
            return h_new

        lax.fori_loop(0, T, step, jnp.zeros((TB, H), jnp.float32), unroll=unroll)

    # ---- output head: fc -> sigmoid, one dense lane-padded bf16 2-D store ----
    logits = jnp.dot(seq_scr[...].astype(jnp.bfloat16), w_fc_ref[...],
                     preferred_element_type=jnp.float32) + b_fc_ref[...]
    out_ref[...] = jax.nn.sigmoid(logits).astype(out_ref.dtype)


def dkt_forward(x, params, layer_dim):
    """x: (B, T, input_dim) float32, batch-first like the PyTorch module."""
    (w_pre, b_pre, w_pre2, b_pre2,
     w_ih0, w_ihr, b_ih, w_hh, b_hh, w_fc, b_fc) = params
    B, T, Din = x.shape
    E = w_pre.shape[1]
    E2 = w_pre2.shape[1]
    H = w_hh.shape[-1]
    Dout = w_fc.shape[1]
    L = layer_dim
    Lr = max(L - 1, 0)

    # ---- lane-dense output (pad fc columns up to a multiple of 128) ----
    Dout_pad = _round_up(Dout, 128)

    # ---- batch tiling: large sublane-dense tiles, >=2 grid steps when the
    #      batch allows (so v7x's second TensorCore gets work) ----
    B8 = _round_up(B, 8)
    TB = min(B8, 128)
    if B8 >= 16 and B8 // TB < 2:
        TB = _round_up((B8 + 1) // 2, 8)

    def footprint(tb):
        # double-buffered x tile + out tile + weights, plus the single scratch
        toks = T * tb
        w_bytes = (2 * (Din * E + E * E2 + E2 * H + Lr * H * H
                        + L * H * H + H * Dout_pad)          # bf16 weights
                   + 4 * (E + E2 + L * H + Dout_pad))        # f32 biases
        return (2 * toks * Din * 2          # x tile, bf16, double-buffered
                + 2 * toks * Dout_pad * 2   # out tile, bf16, double-buffered
                + toks * H * 4              # seq_scr, f32
                + 2 * w_bytes)              # weights, double-buffered

    budget = 40 * 1024 * 1024               # v7x-safe working budget
    while TB > 8 and footprint(TB) > budget:
        TB = max(8, _round_up(TB // 2, 8))

    B_pad = _round_up(B8, TB)
    nb = B_pad // TB

    # Pack input: (B, T, Din) -> pad batch -> (nb, T*TB, Din), time-major rows
    # inside each tile.  All relayout happens here, not in the kernel.
    x_p = jnp.pad(x, ((0, B_pad - B), (0, 0), (0, 0)))
    x_tiles = (x_p.reshape(nb, TB, T, Din)
                  .transpose(0, 2, 1, 3)
                  .reshape(nb, T * TB, Din)
                  .astype(jnp.bfloat16))

    # Weights: bf16 operands everywhere (f32 accumulation in-kernel); biases f32.
    w_pre_b = w_pre.astype(jnp.bfloat16)
    w_pre2_b = w_pre2.astype(jnp.bfloat16)
    w_ih0_b = w_ih0.astype(jnp.bfloat16)
    b_rnn = b_ih + b_hh                               # (L, 1, H) fused bias
    w_hh_b = w_hh.astype(jnp.bfloat16)                # bf16 recurrent weights
    w_fc_b = jnp.pad(w_fc, ((0, 0), (0, Dout_pad - Dout))).astype(jnp.bfloat16)
    b_fc_p = jnp.pad(b_fc, ((0, 0), (0, Dout_pad - Dout)))

    args = [x_tiles, w_pre_b, b_pre, w_pre2_b, b_pre2, w_ih0_b]
    in_specs = [
        pl.BlockSpec((pl.Squeezed(), T * TB, Din), lambda b: (b, 0, 0)),
        pl.BlockSpec((Din, E), lambda b: (0, 0)),
        pl.BlockSpec((1, E), lambda b: (0, 0)),
        pl.BlockSpec((E, E2), lambda b: (0, 0)),
        pl.BlockSpec((1, E2), lambda b: (0, 0)),
        pl.BlockSpec((E2, H), lambda b: (0, 0)),
    ]
    if L > 1:
        w_ihr_b = w_ihr[1:].astype(jnp.bfloat16)      # drop unused layer-0 slab
        args.append(w_ihr_b)
        in_specs.append(pl.BlockSpec((Lr, H, H), lambda b: (0, 0, 0)))
    # (L == 1: no placeholder slab is shipped at all.)
    args += [b_rnn, w_hh_b, w_fc_b, b_fc_p]
    in_specs += [
        pl.BlockSpec((L, 1, H), lambda b: (0, 0, 0)),
        pl.BlockSpec((L, H, H), lambda b: (0, 0, 0)),
        pl.BlockSpec((H, Dout_pad), lambda b: (0, 0)),
        pl.BlockSpec((1, Dout_pad), lambda b: (0, 0)),
    ]

    # VMEM request = real footprint + headroom, capped so it also fits v7x's
    # 64 MiB per-TC VMEM whenever the footprint allows it.
    vmem_limit = int(footprint(TB) * 1.25) + (2 << 20)
    vmem_limit = max(vmem_limit, 16 << 20)
    vmem_limit = min(vmem_limit, 96 << 20)
    if footprint(TB) + (4 << 20) <= (48 << 20):
        vmem_limit = min(vmem_limit, 48 << 20)

    kernel = functools.partial(_dkt_kernel, L, T, TB)
    out_tiles = pl.pallas_call(
        kernel,
        out_shape=jax.ShapeDtypeStruct((nb, T * TB, Dout_pad), jnp.bfloat16),
        grid=(nb,),
        in_specs=in_specs,
        out_specs=pl.BlockSpec((pl.Squeezed(), T * TB, Dout_pad),
                               lambda b: (b, 0, 0)),
        scratch_shapes=[
            pltpu.VMEM((T * TB, H), jnp.float32),   # proj + layer output sequence
        ],
        compiler_params=pltpu.CompilerParams(
            dimension_semantics=("parallel",),
            vmem_limit_bytes=vmem_limit,
        ),
    )(*args)

    # Unpack: (nb, T*TB, Dout_pad) bf16 -> (B, T, Dout) f32
    out = (out_tiles.reshape(nb, T, TB, Dout_pad)
                    .transpose(0, 2, 1, 3)
                    .reshape(B_pad, T, Dout_pad))
    return out[:B, :, :Dout].astype(jnp.float32)


def dkt_reference(x, params, layer_dim):
    """Plain-JAX f32 reference matching the PyTorch forward."""
    (w_pre, b_pre, w_pre2, b_pre2,
     w_ih0, w_ihr, b_ih, w_hh, b_hh, w_fc, b_fc) = params
    B, T, _ = x.shape
    H = w_hh.shape[-1]
    e1 = jnp.maximum(x @ w_pre + b_pre[0], 0.0)
    inp = e1 @ w_pre2 + b_pre2[0]
    for l in range(layer_dim):
        w_ih = w_ih0 if l == 0 else w_ihr[l]
        h = jnp.zeros((B, H), jnp.float32)
        outs = []
        for t in range(T):
            h = jnp.tanh(inp[:, t, :] @ w_ih + b_ih[l, 0] + h @ w_hh[l] + b_hh[l, 0])
            outs.append(h)
        inp = jnp.stack(outs, axis=1)
    return jax.nn.sigmoid(inp @ w_fc + b_fc[0])


def make_params(key, input_dim, hidden_dim, layer_dim, output_dim, embed_dim):
    """Deterministic synthetic parameters (weights stored transposed: y = x @ W + b)."""
    e2 = round(embed_dim / 2)
    ks = jax.random.split(key, 11)
    s = 0.1
    w_pre = s * jax.random.normal(ks[0], (input_dim, embed_dim), jnp.float32)
    b_pre = s * jax.random.normal(ks[1], (1, embed_dim), jnp.float32)
    w_pre2 = s * jax.random.normal(ks[2], (embed_dim, e2), jnp.float32)
    b_pre2 = s * jax.random.normal(ks[3], (1, e2), jnp.float32)
    w_ih0 = s * jax.random.normal(ks[4], (e2, hidden_dim), jnp.float32)
    w_ihr = s * jax.random.normal(ks[5], (layer_dim, hidden_dim, hidden_dim), jnp.float32)
    b_ih = s * jax.random.normal(ks[6], (layer_dim, 1, hidden_dim), jnp.float32)
    w_hh = s * jax.random.normal(ks[7], (layer_dim, hidden_dim, hidden_dim), jnp.float32)
    b_hh = s * jax.random.normal(ks[8], (layer_dim, 1, hidden_dim), jnp.float32)
    w_fc = s * jax.random.normal(ks[9], (hidden_dim, output_dim), jnp.float32)
    b_fc = s * jax.random.normal(ks[10], (1, output_dim), jnp.float32)
    return (w_pre, b_pre, w_pre2, b_pre2, w_ih0, w_ihr, b_ih, w_hh, b_hh, w_fc, b_fc)


if __name__ == "__main__":
    # Small shapes consistent with the module's forward.
    B, T = 2, 8
    input_dim, hidden_dim, layer_dim, output_dim, embed_dim = 16, 32, 2, 16, 32

    key = jax.random.PRNGKey(0)
    kx, kp = jax.random.split(key)
    x = jax.random.normal(kx, (B, T, input_dim), jnp.float32)
    params = make_params(kp, input_dim, hidden_dim, layer_dim, output_dim, embed_dim)

    out = dkt_forward(x, params, layer_dim)
    out = jax.block_until_ready(out)

    ref = dkt_reference(x, params, layer_dim)
    assert out.shape == (B, T, output_dim)
    assert jnp.allclose(out, ref, atol=1e-2, rtol=1e-2), "mismatch vs reference"

    print("KERNEL_OK")
</pallas_src>

<mosaic_0001>
module attributes {stable_mosaic.version = 11 : i64} {
  func.func @_dkt_kernel(%arg0: i32, %arg1: memref<1x64x16xbf16, #tpu.memory_space<vmem>>, %arg2: memref<16x32xbf16, #tpu.memory_space<vmem>>, %arg3: memref<1x32xf32, #tpu.memory_space<vmem>>, %arg4: memref<32x16xbf16, #tpu.memory_space<vmem>>, %arg5: memref<1x16xf32, #tpu.memory_space<vmem>>, %arg6: memref<16x32xbf16, #tpu.memory_space<vmem>>, %arg7: memref<1x32x32xbf16, #tpu.memory_space<vmem>>, %arg8: memref<2x1x32xf32, #tpu.memory_space<vmem>>, %arg9: memref<2x32x32xbf16, #tpu.memory_space<vmem>>, %arg10: memref<32x128xbf16, #tpu.memory_space<vmem>>, %arg11: memref<1x128xf32, #tpu.memory_space<vmem>>, %arg12: memref<1x64x128xbf16, #tpu.memory_space<vmem>>, %arg13: memref<64x32xf32, #tpu.memory_space<vmem>>) attributes {dimension_semantics = [#tpu.dimension_semantics<parallel>], iteration_bounds = array<i64: 1>, scalar_prefetch = 0 : i64, scratch_operands = 1 : i64, tpu.core_type = #tpu.core_type<tc>, window_params = [{transform_indices = @transform_0, window_bounds = array<i64: 1, 64, 16>}, {pipeline_mode = #tpu.pipeline_mode<synchronous>, transform_indices = @transform_1, window_bounds = array<i64: 16, 32>}, {pipeline_mode = #tpu.pipeline_mode<synchronous>, transform_indices = @transform_2, window_bounds = array<i64: 1, 32>}, {pipeline_mode = #tpu.pipeline_mode<synchronous>, transform_indices = @transform_3, window_bounds = array<i64: 32, 16>}, {pipeline_mode = #tpu.pipeline_mode<synchronous>, transform_indices = @transform_4, window_bounds = array<i64: 1, 16>}, {pipeline_mode = #tpu.pipeline_mode<synchronous>, transform_indices = @transform_5, window_bounds = array<i64: 16, 32>}, {pipeline_mode = #tpu.pipeline_mode<synchronous>, transform_indices = @transform_6, window_bounds = array<i64: 1, 32, 32>}, {pipeline_mode = #tpu.pipeline_mode<synchronous>, transform_indices = @transform_7, window_bounds = array<i64: 2, 1, 32>}, {pipeline_mode = #tpu.pipeline_mode<synchronous>, transform_indices = @transform_8, window_bounds = array<i64: 2, 32, 32>}, {pipeline_mode = #tpu.pipeline_mode<synchronous>, transform_indices = @transform_9, window_bounds = array<i64: 32, 128>}, {pipeline_mode = #tpu.pipeline_mode<synchronous>, transform_indices = @transform_10, window_bounds = array<i64: 1, 128>}, {transform_indices = @transform_11, window_bounds = array<i64: 1, 64, 128>}]} {
    %c0 = arith.constant 0 : index
    %c0_0 = arith.constant 0 : index
    %c0_1 = arith.constant 0 : index
    %0 = vector.load %arg1[%c0, %c0_0, %c0_1] : memref<1x64x16xbf16, #tpu.memory_space<vmem>>, vector<1x64x16xbf16>
    %1 = vector.shape_cast %0 : vector<1x64x16xbf16> to vector<64x16xbf16>
    %c0_2 = arith.constant 0 : index
    %c0_3 = arith.constant 0 : index
    %2 = vector.load %arg2[%c0_2, %c0_3] : memref<16x32xbf16, #tpu.memory_space<vmem>>, vector<16x32xbf16>
    %cst = arith.constant dense<0.000000e+00> : vector<64x32xf32>
    %3 = tpu.matmul %1, %2, %cst {dimension_numbers = #tpu.dot_dimension_numbers<[1], [0], [0], [1], [0, 0, 1, 1], [], []>} : vector<64x16xbf16>, vector<16x32xbf16>, vector<64x32xf32> -> vector<64x32xf32>
    %c0_4 = arith.constant 0 : index
    %c0_5 = arith.constant 0 : index
    %4 = vector.load %arg3[%c0_4, %c0_5] : memref<1x32xf32, #tpu.memory_space<vmem>>, vector<1x32xf32>
    %5 = vector.broadcast %4 : vector<1x32xf32> to vector<64x32xf32>
    %6 = arith.addf %3, %5 : vector<64x32xf32>
    %cst_6 = arith.constant 0.000000e+00 : f32
    %7 = vector.broadcast %cst_6 : f32 to vector<64x32xf32>
    %8 = arith.maximumf %6, %7 : vector<64x32xf32>
    %9 = arith.truncf %8 : vector<64x32xf32> to vector<64x32xbf16>
    %c0_7 = arith.constant 0 : index
    %c0_8 = arith.constant 0 : index
    %10 = vector.load %arg4[%c0_7, %c0_8] : memref<32x16xbf16, #tpu.memory_space<vmem>>, vector<32x16xbf16>
    %cst_9 = arith.constant dense<0.000000e+00> : vector<64x16xf32>
    %11 = tpu.matmul %9, %10, %cst_9 {dimension_numbers = #tpu.dot_dimension_numbers<[1], [0], [0], [1], [0, 0, 1, 1], [], []>} : vector<64x32xbf16>, vector<32x16xbf16>, vector<64x16xf32> -> vector<64x16xf32>
    %c0_10 = arith.constant 0 : index
    %c0_11 = arith.constant 0 : index
    %12 = vector.load %arg5[%c0_10, %c0_11] : memref<1x16xf32, #tpu.memory_space<vmem>>, vector<1x16xf32>
    %13 = vector.broadcast %12 : vector<1x16xf32> to vector<64x16xf32>
    %14 = arith.addf %11, %13 : vector<64x16xf32>
    %15 = arith.truncf %14 : vector<64x16xf32> to vector<64x16xbf16>
    %c0_12 = arith.constant 0 : index
    %c0_13 = arith.constant 0 : index
    %16 = vector.load %arg6[%c0_12, %c0_13] : memref<16x32xbf16, #tpu.memory_space<vmem>>, vector<16x32xbf16>
    %cst_14 = arith.constant dense<0.000000e+00> : vector<64x32xf32>
    %17 = tpu.matmul %15, %16, %cst_14 {dimension_numbers = #tpu.dot_dimension_numbers<[1], [0], [0], [1], [0, 0, 1, 1], [], []>} : vector<64x16xbf16>, vector<16x32xbf16>, vector<64x32xf32> -> vector<64x32xf32>
    %c0_15 = arith.constant 0 : index
    %c0_16 = arith.constant 0 : index
    %c0_17 = arith.constant 0 : index
    %18 = vector.load %arg8[%c0_15, %c0_16, %c0_17] : memref<2x1x32xf32, #tpu.memory_space<vmem>>, vector<1x1x32xf32>
    %19 = vector.shape_cast %18 : vector<1x1x32xf32> to vector<1x32xf32>
    %20 = vector.broadcast %19 : vector<1x32xf32> to vector<64x32xf32>
    %21 = arith.addf %17, %20 : vector<64x32xf32>
    %c0_18 = arith.constant 0 : index
    %c0_19 = arith.constant 0 : index
    %22 = vector.load %arg13[%c0_18, %c0_19] : memref<64x32xf32, #tpu.memory_space<vmem>>, vector<64x32xf32>
    tpu.vector_store %arg13[%c0_18, %c0_19], %21 {strides = array<i32>} : memref<64x32xf32, #tpu.memory_space<vmem>>, vector<64x32xf32>,
    %c0_20 = arith.constant 0 : index
    %c0_21 = arith.constant 0 : index
    %c0_22 = arith.constant 0 : index
    %23 = vector.load %arg9[%c0_20, %c0_21, %c0_22] : memref<2x32x32xbf16, #tpu.memory_space<vmem>>, vector<1x32x32xbf16>
    %24 = vector.shape_cast %23 : vector<1x32x32xbf16> to vector<32x32xbf16>
    %cst_23 = arith.constant 0.000000e+00 : f32
    %25 = vector.broadcast %cst_23 : f32 to vector<8x32xf32>
    %c0_i32 = arith.constant 0 : i32
    %c8_i32 = arith.constant 8 : i32
    %26 = arith.muli %c0_i32, %c8_i32 : i32
    %27 = tpu.assume_multiple %26, 8 : i32
    %28 = arith.index_cast %27 : i32 to index
    %c0_24 = arith.constant 0 : index
    %29 = vector.load %arg13[%28, %c0_24] : memref<64x32xf32, #tpu.memory_space<vmem>>, vector<8x32xf32>
    %30 = arith.truncf %25 : vector<8x32xf32> to vector<8x32xbf16>
    %cst_25 = arith.constant dense<0.000000e+00> : vector<8x32xf32>
    %31 = tpu.matmul %30, %24, %cst_25 {dimension_numbers = #tpu.dot_dimension_numbers<[1], [0], [0], [1], [0, 0, 1, 1], [], []>} : vector<8x32xbf16>, vector<32x32xbf16>, vector<8x32xf32> -> vector<8x32xf32>
    %32 = arith.addf %29, %31 : vector<8x32xf32>
    %33 = math.tanh %32 : vector<8x32xf32>
    %34 = arith.index_cast %27 : i32 to index
    %c0_26 = arith.constant 0 : index
    %35 = vector.load %arg13[%34, %c0_26] : memref<64x32xf32, #tpu.memory_space<vmem>>, vector<8x32xf32>
    tpu.vector_store %arg13[%34, %c0_26], %33 {strides = array<i32>} : memref<64x32xf32, #tpu.memory_space<vmem>>, vector<8x32xf32>,
    %c1_i32 = arith.constant 1 : i32
    %c8_i32_27 = arith.constant 8 : i32
    %36 = arith.muli %c1_i32, %c8_i32_27 : i32
    %37 = tpu.assume_multiple %36, 8 : i32
    %38 = arith.index_cast %37 : i32 to index
    %c0_28 = arith.constant 0 : index
    %39 = vector.load %arg13[%38, %c0_28] : memref<64x32xf32, #tpu.memory_space<vmem>>, vector<8x32xf32>
    %40 = arith.truncf %33 : vector<8x32xf32> to vector<8x32xbf16>
    %cst_29 = arith.constant dense<0.000000e+00> : vector<8x32xf32>
    %41 = tpu.matmul %40, %24, %cst_29 {dimension_numbers = #tpu.dot_dimension_numbers<[1], [0], [0], [1], [0, 0, 1, 1], [], []>} : vector<8x32xbf16>, vector<32x32xbf16>, vector<8x32xf32> -> vector<8x32xf32>
    %42 = arith.addf %39, %41 : vector<8x32xf32>
    %43 = math.tanh %42 : vector<8x32xf32>
    %44 = arith.index_cast %37 : i32 to index
    %c0_30 = arith.constant 0 : index
    %45 = vector.load %arg13[%44, %c0_30] : memref<64x32xf32, #tpu.memory_space<vmem>>, vector<8x32xf32>
    tpu.vector_store %arg13[%44, %c0_30], %43 {strides = array<i32>} : memref<64x32xf32, #tpu.memory_space<vmem>>, vector<8x32xf32>,
    %c2_i32 = arith.constant 2 : i32
    %c8_i32_31 = arith.constant 8 : i32
    %46 = arith.muli %c2_i32, %c8_i32_31 : i32
    %47 = tpu.assume_multiple %46, 8 : i32
    %48 = arith.index_cast %47 : i32 to index
    %c0_32 = arith.constant 0 : index
    %49 = vector.load %arg13[%48, %c0_32] : memref<64x32xf32, #tpu.memory_space<vmem>>, vector<8x32xf32>
    %50 = arith.truncf %43 : vector<8x32xf32> to vector<8x32xbf16>
    %cst_33 = arith.constant dense<0.000000e+00> : vector<8x32xf32>
    %51 = tpu.matmul %50, %24, %cst_33 {dimension_numbers = #tpu.dot_dimension_numbers<[1], [0], [0], [1], [0, 0, 1, 1], [], []>} : vector<8x32xbf16>, vector<32x32xbf16>, vector<8x32xf32> -> vector<8x32xf32>
    %52 = arith.addf %49, %51 : vector<8x32xf32>
    %53 = math.tanh %52 : vector<8x32xf32>
    %54 = arith.index_cast %47 : i32 to index
    %c0_34 = arith.constant 0 : index
    %55 = vector.load %arg13[%54, %c0_34] : memref<64x32xf32, #tpu.memory_space<vmem>>, vector<8x32xf32>
    tpu.vector_store %arg13[%54, %c0_34], %53 {strides = array<i32>} : memref<64x32xf32, #tpu.memory_space<vmem>>, vector<8x32xf32>,
    %c3_i32 = arith.constant 3 : i32
    %c8_i32_35 = arith.constant 8 : i32
    %56 = arith.muli %c3_i32, %c8_i32_35 : i32
    %57 = tpu.assume_multiple %56, 8 : i32
    %58 = arith.index_cast %57 : i32 to index
    %c0_36 = arith.constant 0 : index
    %59 = vector.load %arg13[%58, %c0_36] : memref<64x32xf32, #tpu.memory_space<vmem>>, vector<8x32xf32>
    %60 = arith.truncf %53 : vector<8x32xf32> to vector<8x32xbf16>
    %cst_37 = arith.constant dense<0.000000e+00> : vector<8x32xf32>
    %61 = tpu.matmul %60, %24, %cst_37 {dimension_numbers = #tpu.dot_dimension_numbers<[1], [0], [0], [1], [0, 0, 1, 1], [], []>} : vector<8x32xbf16>, vector<32x32xbf16>, vector<8x32xf32> -> vector<8x32xf32>
    %62 = arith.addf %59, %61 : vector<8x32xf32>
    %63 = math.tanh %62 : vector<8x32xf32>
    %64 = arith.index_cast %57 : i32 to index
    %c0_38 = arith.constant 0 : index
    %65 = vector.load %arg13[%64, %c0_38] : memref<64x32xf32, #tpu.memory_space<vmem>>, vector<8x32xf32>
    tpu.vector_store %arg13[%64, %c0_38], %63 {strides = array<i32>} : memref<64x32xf32, #tpu.memory_space<vmem>>, vector<8x32xf32>,
    %c4_i32 = arith.constant 4 : i32
    %c8_i32_39 = arith.constant 8 : i32
    %66 = arith.muli %c4_i32, %c8_i32_39 : i32
    %67 = tpu.assume_multiple %66, 8 : i32
    %68 = arith.index_cast %67 : i32 to index
    %c0_40 = arith.constant 0 : index
    %69 = vector.load %arg13[%68, %c0_40] : memref<64x32xf32, #tpu.memory_space<vmem>>, vector<8x32xf32>
    %70 = arith.truncf %63 : vector<8x32xf32> to vector<8x32xbf16>
    %cst_41 = arith.constant dense<0.000000e+00> : vector<8x32xf32>
    %71 = tpu.matmul %70, %24, %cst_41 {dimension_numbers = #tpu.dot_dimension_numbers<[1], [0], [0], [1], [0, 0, 1, 1], [], []>} : vector<8x32xbf16>, vector<32x32xbf16>, vector<8x32xf32> -> vector<8x32xf32>
    %72 = arith.addf %69, %71 : vector<8x32xf32>
    %73 = math.tanh %72 : vector<8x32xf32>
    %74 = arith.index_cast %67 : i32 to index
    %c0_42 = arith.constant 0 : index
    %75 = vector.load %arg13[%74, %c0_42] : memref<64x32xf32, #tpu.memory_space<vmem>>, vector<8x32xf32>
    tpu.vector_store %arg13[%74, %c0_42], %73 {strides = array<i32>} : memref<64x32xf32, #tpu.memory_space<vmem>>, vector<8x32xf32>,
    %c5_i32 = arith.constant 5 : i32
    %c8_i32_43 = arith.constant 8 : i32
    %76 = arith.muli %c5_i32, %c8_i32_43 : i32
    %77 = tpu.assume_multiple %76, 8 : i32
    %78 = arith.index_cast %77 : i32 to index
    %c0_44 = arith.constant 0 : index
    %79 = vector.load %arg13[%78, %c0_44] : memref<64x32xf32, #tpu.memory_space<vmem>>, vector<8x32xf32>
    %80 = arith.truncf %73 : vector<8x32xf32> to vector<8x32xbf16>
    %cst_45 = arith.constant dense<0.000000e+00> : vector<8x32xf32>
    %81 = tpu.matmul %80, %24, %cst_45 {dimension_numbers = #tpu.dot_dimension_numbers<[1], [0], [0], [1], [0, 0, 1, 1], [], []>} : vector<8x32xbf16>, vector<32x32xbf16>, vector<8x32xf32> -> vector<8x32xf32>
    %82 = arith.addf %79, %81 : vector<8x32xf32>
    %83 = math.tanh %82 : vector<8x32xf32>
    %84 = arith.index_cast %77 : i32 to index
    %c0_46 = arith.constant 0 : index
    %85 = vector.load %arg13[%84, %c0_46] : memref<64x32xf32, #tpu.memory_space<vmem>>, vector<8x32xf32>
    tpu.vector_store %arg13[%84, %c0_46], %83 {strides = array<i32>} : memref<64x32xf32, #tpu.memory_space<vmem>>, vector<8x32xf32>,
    %c6_i32 = arith.constant 6 : i32
    %c8_i32_47 = arith.constant 8 : i32
    %86 = arith.muli %c6_i32, %c8_i32_47 : i32
    %87 = tpu.assume_multiple %86, 8 : i32
    %88 = arith.index_cast %87 : i32 to index
    %c0_48 = arith.constant 0 : index
    %89 = vector.load %arg13[%88, %c0_48] : memref<64x32xf32, #tpu.memory_space<vmem>>, vector<8x32xf32>
    %90 = arith.truncf %83 : vector<8x32xf32> to vector<8x32xbf16>
    %cst_49 = arith.constant dense<0.000000e+00> : vector<8x32xf32>
    %91 = tpu.matmul %90, %24, %cst_49 {dimension_numbers = #tpu.dot_dimension_numbers<[1], [0], [0], [1], [0, 0, 1, 1], [], []>} : vector<8x32xbf16>, vector<32x32xbf16>, vector<8x32xf32> -> vector<8x32xf32>
    %92 = arith.addf %89, %91 : vector<8x32xf32>
    %93 = math.tanh %92 : vector<8x32xf32>
    %94 = arith.index_cast %87 : i32 to index
    %c0_50 = arith.constant 0 : index
    %95 = vector.load %arg13[%94, %c0_50] : memref<64x32xf32, #tpu.memory_space<vmem>>, vector<8x32xf32>
    tpu.vector_store %arg13[%94, %c0_50], %93 {strides = array<i32>} : memref<64x32xf32, #tpu.memory_space<vmem>>, vector<8x32xf32>,
    %c7_i32 = arith.constant 7 : i32
    %c8_i32_51 = arith.constant 8 : i32
    %96 = arith.muli %c7_i32, %c8_i32_51 : i32
    %97 = tpu.assume_multiple %96, 8 : i32
    %98 = arith.index_cast %97 : i32 to index
    %c0_52 = arith.constant 0 : index
    %99 = vector.load %arg13[%98, %c0_52] : memref<64x32xf32, #tpu.memory_space<vmem>>, vector<8x32xf32>
    %100 = arith.truncf %93 : vector<8x32xf32> to vector<8x32xbf16>
    %cst_53 = arith.constant dense<0.000000e+00> : vector<8x32xf32>
    %101 = tpu.matmul %100, %24, %cst_53 {dimension_numbers = #tpu.dot_dimension_numbers<[1], [0], [0], [1], [0, 0, 1, 1], [], []>} : vector<8x32xbf16>, vector<32x32xbf16>, vector<8x32xf32> -> vector<8x32xf32>
    %102 = arith.addf %99, %101 : vector<8x32xf32>
    %103 = math.tanh %102 : vector<8x32xf32>
    %104 = arith.index_cast %97 : i32 to index
    %c0_54 = arith.constant 0 : index
    %105 = vector.load %arg13[%104, %c0_54] : memref<64x32xf32, #tpu.memory_space<vmem>>, vector<8x32xf32>
    tpu.vector_store %arg13[%104, %c0_54], %103 {strides = array<i32>} : memref<64x32xf32, #tpu.memory_space<vmem>>, vector<8x32xf32>,
    %c8_i32_55 = arith.constant 8 : i32
    %c0_56 = arith.constant 0 : index
    %c0_57 = arith.constant 0 : index
    %106 = vector.load %arg13[%c0_56, %c0_57] : memref<64x32xf32, #tpu.memory_space<vmem>>, vector<64x32xf32>
    %107 = arith.truncf %106 : vector<64x32xf32> to vector<64x32xbf16>
    %c0_58 = arith.constant 0 : index
    %c0_59 = arith.constant 0 : index
    %c0_60 = arith.constant 0 : index
    %108 = vector.load %arg7[%c0_58, %c0_59, %c0_60] : memref<1x32x32xbf16, #tpu.memory_space<vmem>>, vector<1x32x32xbf16>
    %109 = vector.shape_cast %108 : vector<1x32x32xbf16> to vector<32x32xbf16>
    %cst_61 = arith.constant dense<0.000000e+00> : vector<64x32xf32>
    %110 = tpu.matmul %107, %109, %cst_61 {dimension_numbers = #tpu.dot_dimension_numbers<[1], [0], [0], [1], [0, 0, 1, 1], [], []>} : vector<64x32xbf16>, vector<32x32xbf16>, vector<64x32xf32> -> vector<64x32xf32>
    %c1 = arith.constant 1 : index
    %c0_62 = arith.constant 0 : index
    %c0_63 = arith.constant 0 : index
    %111 = vector.load %arg8[%c1, %c0_62, %c0_63] : memref<2x1x32xf32, #tpu.memory_space<vmem>>, vector<1x1x32xf32>
    %112 = vector.shape_cast %111 : vector<1x1x32xf32> to vector<1x32xf32>
    %113 = vector.broadcast %112 : vector<1x32xf32> to vector<64x32xf32>
    %114 = arith.addf %110, %113 : vector<64x32xf32>
    %c0_64 = arith.constant 0 : index
    %c0_65 = arith.constant 0 : index
    %115 = vector.load %arg13[%c0_64, %c0_65] : memref<64x32xf32, #tpu.memory_space<vmem>>, vector<64x32xf32>
    tpu.vector_store %arg13[%c0_64, %c0_65], %114 {strides = array<i32>} : memref<64x32xf32, #tpu.memory_space<vmem>>, vector<64x32xf32>,
    %c1_66 = arith.constant 1 : index
    %c0_67 = arith.constant 0 : index
    %c0_68 = arith.constant 0 : index
    %116 = vector.load %arg9[%c1_66, %c0_67, %c0_68] : memref<2x32x32xbf16, #tpu.memory_space<vmem>>, vector<1x32x32xbf16>
    %117 = vector.shape_cast %116 : vector<1x32x32xbf16> to vector<32x32xbf16>
    %cst_69 = arith.constant 0.000000e+00 : f32
    %118 = vector.broadcast %cst_69 : f32 to vector<8x32xf32>
    %c0_i32_70 = arith.constant 0 : i32
    %c8_i32_71 = arith.constant 8 : i32
    %119 = arith.muli %c0_i32_70, %c8_i32_71 : i32
    %120 = tpu.assume_multiple %119, 8 : i32
    %121 = arith.index_cast %120 : i32 to index
    %c0_72 = arith.constant 0 : index
    %122 = vector.load %arg13[%121, %c0_72] : memref<64x32xf32, #tpu.memory_space<vmem>>, vector<8x32xf32>
    %123 = arith.truncf %118 : vector<8x32xf32> to vector<8x32xbf16>
    %cst_73 = arith.constant dense<0.000000e+00> : vector<8x32xf32>
    %124 = tpu.matmul %123, %117, %cst_73 {dimension_numbers = #tpu.dot_dimension_numbers<[1], [0], [0], [1], [0, 0, 1, 1], [], []>} : vector<8x32xbf16>, vector<32x32xbf16>, vector<8x32xf32> -> vector<8x32xf32>
    %125 = arith.addf %122, %124 : vector<8x32xf32>
    %126 = math.tanh %125 : vector<8x32xf32>
    %127 = arith.index_cast %120 : i32 to index
    %c0_74 = arith.constant 0 : index
    %128 = vector.load %arg13[%127, %c0_74] : memref<64x32xf32, #tpu.memory_space<vmem>>, vector<8x32xf32>
    tpu.vector_store %arg13[%127, %c0_74], %126 {strides = array<i32>} : memref<64x32xf32, #tpu.memory_space<vmem>>, vector<8x32xf32>,
    %c1_i32_75 = arith.constant 1 : i32
    %c8_i32_76 = arith.constant 8 : i32
    %129 = arith.muli %c1_i32_75, %c8_i32_76 : i32
    %130 = tpu.assume_multiple %129, 8 : i32
    %131 = arith.index_cast %130 : i32 to index
    %c0_77 = arith.constant 0 : index
    %132 = vector.load %arg13[%131, %c0_77] : memref<64x32xf32, #tpu.memory_space<vmem>>, vector<8x32xf32>
    %133 = arith.truncf %126 : vector<8x32xf32> to vector<8x32xbf16>
    %cst_78 = arith.constant dense<0.000000e+00> : vector<8x32xf32>
    %134 = tpu.matmul %133, %117, %cst_78 {dimension_numbers = #tpu.dot_dimension_numbers<[1], [0], [0], [1], [0, 0, 1, 1], [], []>} : vector<8x32xbf16>, vector<32x32xbf16>, vector<8x32xf32> -> vector<8x32xf32>
    %135 = arith.addf %132, %134 : vector<8x32xf32>
    %136 = math.tanh %135 : vector<8x32xf32>
    %137 = arith.index_cast %130 : i32 to index
    %c0_79 = arith.constant 0 : index
    %138 = vector.load %arg13[%137, %c0_79] : memref<64x32xf32, #tpu.memory_space<vmem>>, vector<8x32xf32>
    tpu.vector_store %arg13[%137, %c0_79], %136 {strides = array<i32>} : memref<64x32xf32, #tpu.memory_space<vmem>>, vector<8x32xf32>,
    %c2_i32_80 = arith.constant 2 : i32
    %c8_i32_81 = arith.constant 8 : i32
    %139 = arith.muli %c2_i32_80, %c8_i32_81 : i32
    %140 = tpu.assume_multiple %139, 8 : i32
    %141 = arith.index_cast %140 : i32 to index
    %c0_82 = arith.constant 0 : index
    %142 = vector.load %arg13[%141, %c0_82] : memref<64x32xf32, #tpu.memory_space<vmem>>, vector<8x32xf32>
    %143 = arith.truncf %136 : vector<8x32xf32> to vector<8x32xbf16>
    %cst_83 = arith.constant dense<0.000000e+00> : vector<8x32xf32>
    %144 = tpu.matmul %143, %117, %cst_83 {dimension_numbers = #tpu.dot_dimension_numbers<[1], [0], [0], [1], [0, 0, 1, 1], [], []>} : vector<8x32xbf16>, vector<32x32xbf16>, vector<8x32xf32> -> vector<8x32xf32>
    %145 = arith.addf %142, %144 : vector<8x32xf32>
    %146 = math.tanh %145 : vector<8x32xf32>
    %147 = arith.index_cast %140 : i32 to index
    %c0_84 = arith.constant 0 : index
    %148 = vector.load %arg13[%147, %c0_84] : memref<64x32xf32, #tpu.memory_space<vmem>>, vector<8x32xf32>
    tpu.vector_store %arg13[%147, %c0_84], %146 {strides = array<i32>} : memref<64x32xf32, #tpu.memory_space<vmem>>, vector<8x32xf32>,
    %c3_i32_85 = arith.constant 3 : i32
    %c8_i32_86 = arith.constant 8 : i32
    %149 = arith.muli %c3_i32_85, %c8_i32_86 : i32
    %150 = tpu.assume_multiple %149, 8 : i32
    %151 = arith.index_cast %150 : i32 to index
    %c0_87 = arith.constant 0 : index
    %152 = vector.load %arg13[%151, %c0_87] : memref<64x32xf32, #tpu.memory_space<vmem>>, vector<8x32xf32>
    %153 = arith.truncf %146 : vector<8x32xf32> to vector<8x32xbf16>
    %cst_88 = arith.constant dense<0.000000e+00> : vector<8x32xf32>
    %154 = tpu.matmul %153, %117, %cst_88 {dimension_numbers = #tpu.dot_dimension_numbers<[1], [0], [0], [1], [0, 0, 1, 1], [], []>} : vector<8x32xbf16>, vector<32x32xbf16>, vector<8x32xf32> -> vector<8x32xf32>
    %155 = arith.addf %152, %154 : vector<8x32xf32>
    %156 = math.tanh %155 : vector<8x32xf32>
    %157 = arith.index_cast %150 : i32 to index
    %c0_89 = arith.constant 0 : index
    %158 = vector.load %arg13[%157, %c0_89] : memref<64x32xf32, #tpu.memory_space<vmem>>, vector<8x32xf32>
    tpu.vector_store %arg13[%157, %c0_89], %156 {strides = array<i32>} : memref<64x32xf32, #tpu.memory_space<vmem>>, vector<8x32xf32>,
    %c4_i32_90 = arith.constant 4 : i32
    %c8_i32_91 = arith.constant 8 : i32
    %159 = arith.muli %c4_i32_90, %c8_i32_91 : i32
    %160 = tpu.assume_multiple %159, 8 : i32
    %161 = arith.index_cast %160 : i32 to index
    %c0_92 = arith.constant 0 : index
    %162 = vector.load %arg13[%161, %c0_92] : memref<64x32xf32, #tpu.memory_space<vmem>>, vector<8x32xf32>
    %163 = arith.truncf %156 : vector<8x32xf32> to vector<8x32xbf16>
    %cst_93 = arith.constant dense<0.000000e+00> : vector<8x32xf32>
    %164 = tpu.matmul %163, %117, %cst_93 {dimension_numbers = #tpu.dot_dimension_numbers<[1], [0], [0], [1], [0, 0, 1, 1], [], []>} : vector<8x32xbf16>, vector<32x32xbf16>, vector<8x32xf32> -> vector<8x32xf32>
    %165 = arith.addf %162, %164 : vector<8x32xf32>
    %166 = math.tanh %165 : vector<8x32xf32>
    %167 = arith.index_cast %160 : i32 to index
    %c0_94 = arith.constant 0 : index
    %168 = vector.load %arg13[%167, %c0_94] : memref<64x32xf32, #tpu.memory_space<vmem>>, vector<8x32xf32>
    tpu.vector_store %arg13[%167, %c0_94], %166 {strides = array<i32>} : memref<64x32xf32, #tpu.memory_space<vmem>>, vector<8x32xf32>,
    %c5_i32_95 = arith.constant 5 : i32
    %c8_i32_96 = arith.constant 8 : i32
    %169 = arith.muli %c5_i32_95, %c8_i32_96 : i32
    %170 = tpu.assume_multiple %169, 8 : i32
    %171 = arith.index_cast %170 : i32 to index
    %c0_97 = arith.constant 0 : index
    %172 = vector.load %arg13[%171, %c0_97] : memref<64x32xf32, #tpu.memory_space<vmem>>, vector<8x32xf32>
    %173 = arith.truncf %166 : vector<8x32xf32> to vector<8x32xbf16>
    %cst_98 = arith.constant dense<0.000000e+00> : vector<8x32xf32>
    %174 = tpu.matmul %173, %117, %cst_98 {dimension_numbers = #tpu.dot_dimension_numbers<[1], [0], [0], [1], [0, 0, 1, 1], [], []>} : vector<8x32xbf16>, vector<32x32xbf16>, vector<8x32xf32> -> vector<8x32xf32>
    %175 = arith.addf %172, %174 : vector<8x32xf32>
    %176 = math.tanh %175 : vector<8x32xf32>
    %177 = arith.index_cast %170 : i32 to index
    %c0_99 = arith.constant 0 : index
    %178 = vector.load %arg13[%177, %c0_99] : memref<64x32xf32, #tpu.memory_space<vmem>>, vector<8x32xf32>
    tpu.vector_store %arg13[%177, %c0_99], %176 {strides = array<i32>} : memref<64x32xf32, #tpu.memory_space<vmem>>, vector<8x32xf32>,
    %c6_i32_100 = arith.constant 6 : i32
    %c8_i32_101 = arith.constant 8 : i32
    %179 = arith.muli %c6_i32_100, %c8_i32_101 : i32
    %180 = tpu.assume_multiple %179, 8 : i32
    %181 = arith.index_cast %180 : i32 to index
    %c0_102 = arith.constant 0 : index
    %182 = vector.load %arg13[%181, %c0_102] : memref<64x32xf32, #tpu.memory_space<vmem>>, vector<8x32xf32>
    %183 = arith.truncf %176 : vector<8x32xf32> to vector<8x32xbf16>
    %cst_103 = arith.constant dense<0.000000e+00> : vector<8x32xf32>
    %184 = tpu.matmul %183, %117, %cst_103 {dimension_numbers = #tpu.dot_dimension_numbers<[1], [0], [0], [1], [0, 0, 1, 1], [], []>} : vector<8x32xbf16>, vector<32x32xbf16>, vector<8x32xf32> -> vector<8x32xf32>
    %185 = arith.addf %182, %184 : vector<8x32xf32>
    %186 = math.tanh %185 : vector<8x32xf32>
    %187 = arith.index_cast %180 : i32 to index
    %c0_104 = arith.constant 0 : index
    %188 = vector.load %arg13[%187, %c0_104] : memref<64x32xf32, #tpu.memory_space<vmem>>, vector<8x32xf32>
    tpu.vector_store %arg13[%187, %c0_104], %186 {strides = array<i32>} : memref<64x32xf32, #tpu.memory_space<vmem>>, vector<8x32xf32>,
    %c7_i32_105 = arith.constant 7 : i32
    %c8_i32_106 = arith.constant 8 : i32
    %189 = arith.muli %c7_i32_105, %c8_i32_106 : i32
    %190 = tpu.assume_multiple %189, 8 : i32
    %191 = arith.index_cast %190 : i32 to index
    %c0_107 = arith.constant 0 : index
    %192 = vector.load %arg13[%191, %c0_107] : memref<64x32xf32, #tpu.memory_space<vmem>>, vector<8x32xf32>
    %193 = arith.truncf %186 : vector<8x32xf32> to vector<8x32xbf16>
    %cst_108 = arith.constant dense<0.000000e+00> : vector<8x32xf32>
    %194 = tpu.matmul %193, %117, %cst_108 {dimension_numbers = #tpu.dot_dimension_numbers<[1], [0], [0], [1], [0, 0, 1, 1], [], []>} : vector<8x32xbf16>, vector<32x32xbf16>, vector<8x32xf32> -> vector<8x32xf32>
    %195 = arith.addf %192, %194 : vector<8x32xf32>
    %196 = math.tanh %195 : vector<8x32xf32>
    %197 = arith.index_cast %190 : i32 to index
    %c0_109 = arith.constant 0 : index
    %198 = vector.load %arg13[%197, %c0_109] : memref<64x32xf32, #tpu.memory_space<vmem>>, vector<8x32xf32>
    tpu.vector_store %arg13[%197, %c0_109], %196 {strides = array<i32>} : memref<64x32xf32, #tpu.memory_space<vmem>>, vector<8x32xf32>,
    %c8_i32_110 = arith.constant 8 : i32
    %c0_111 = arith.constant 0 : index
    %c0_112 = arith.constant 0 : index
    %199 = vector.load %arg13[%c0_111, %c0_112] : memref<64x32xf32, #tpu.memory_space<vmem>>, vector<64x32xf32>
    %200 = arith.truncf %199 : vector<64x32xf32> to vector<64x32xbf16>
    %c0_113 = arith.constant 0 : index
    %c0_114 = arith.constant 0 : index
    %201 = vector.load %arg10[%c0_113, %c0_114] : memref<32x128xbf16, #tpu.memory_space<vmem>>, vector<32x128xbf16>
    %cst_115 = arith.constant dense<0.000000e+00> : vector<64x128xf32>
    %202 = tpu.matmul %200, %201, %cst_115 {dimension_numbers = #tpu.dot_dimension_numbers<[1], [0], [0], [1], [0, 0, 1, 1], [], []>} : vector<64x32xbf16>, vector<32x128xbf16>, vector<64x128xf32> -> vector<64x128xf32>
    %c0_116 = arith.constant 0 : index
    %c0_117 = arith.constant 0 : index
    %203 = vector.load %arg11[%c0_116, %c0_117] : memref<1x128xf32, #tpu.memory_space<vmem>>, vector<1x128xf32>
    %204 = vector.broadcast %203 : vector<1x128xf32> to vector<64x128xf32>
    %205 = arith.addf %202, %204 : vector<64x128xf32>
    %206 = arith.negf %205 : vector<64x128xf32>
    %207 = math.exp %206 : vector<64x128xf32>
    %cst_118 = arith.constant 1.000000e+00 : f32
    %208 = vector.broadcast %cst_118 : f32 to vector<64x128xf32>
    %209 = arith.addf %208, %207 : vector<64x128xf32>
    %210 = arith.divf %208, %209 : vector<64x128xf32>
    %211 = arith.truncf %210 : vector<64x128xf32> to vector<64x128xbf16>
    %c0_119 = arith.constant 0 : index
    %c0_120 = arith.constant 0 : index
    %c0_121 = arith.constant 0 : index
    %212 = vector.load %arg12[%c0_119, %c0_120, %c0_121] : memref<1x64x128xbf16, #tpu.memory_space<vmem>>, vector<1x64x128xbf16>
    %213 = vector.shape_cast %212 : vector<1x64x128xbf16> to vector<64x128xbf16>
    %214 = vector.shape_cast %211 : vector<64x128xbf16> to vector<1x64x128xbf16>
    tpu.vector_store %arg12[%c0_119, %c0_120, %c0_121], %214 {strides = array<i32>} : memref<1x64x128xbf16, #tpu.memory_space<vmem>>, vector<1x64x128xbf16>,
    return
  }
  func.func @transform_0(%arg0: i32) -> (i32, i32, i32) {
    %c0_i32 = arith.constant 0 : i32
    %c0_i32_0 = arith.constant 0 : i32
    %c0_i32_1 = arith.constant 0 : i32
    return %arg0, %c0_i32, %c0_i32_0 : i32, i32, i32
  }
  func.func @transform_1(%arg0: i32) -> (i32, i32) {
    %c0_i32 = arith.constant 0 : i32
    %c0_i32_0 = arith.constant 0 : i32
    %c0_i32_1 = arith.constant 0 : i32
    return %c0_i32, %c0_i32_0 : i32, i32
  }
  func.func @transform_2(%arg0: i32) -> (i32, i32) {
    %c0_i32 = arith.constant 0 : i32
    %c0_i32_0 = arith.constant 0 : i32
    %c0_i32_1 = arith.constant 0 : i32
    return %c0_i32, %c0_i32_0 : i32, i32
  }
  func.func @transform_3(%arg0: i32) -> (i32, i32) {
    %c0_i32 = arith.constant 0 : i32
    %c0_i32_0 = arith.constant 0 : i32
    %c0_i32_1 = arith.constant 0 : i32
    return %c0_i32, %c0_i32_0 : i32, i32
  }
  func.func @transform_4(%arg0: i32) -> (i32, i32) {
    %c0_i32 = arith.constant 0 : i32
    %c0_i32_0 = arith.constant 0 : i32
    %c0_i32_1 = arith.constant 0 : i32
    return %c0_i32, %c0_i32_0 : i32, i32
  }
  func.func @transform_5(%arg0: i32) -> (i32, i32) {
    %c0_i32 = arith.constant 0 : i32
    %c0_i32_0 = arith.constant 0 : i32
    %c0_i32_1 = arith.constant 0 : i32
    return %c0_i32, %c0_i32_0 : i32, i32
  }
  func.func @transform_6(%arg0: i32) -> (i32, i32, i32) {
    %c0_i32 = arith.constant 0 : i32
    %c0_i32_0 = arith.constant 0 : i32
    %c0_i32_1 = arith.constant 0 : i32
    %c0_i32_2 = arith.constant 0 : i32
    return %c0_i32, %c0_i32_0, %c0_i32_1 : i32, i32, i32
  }
  func.func @transform_7(%arg0: i32) -> (i32, i32, i32) {
    %c0_i32 = arith.constant 0 : i32
    %c0_i32_0 = arith.constant 0 : i32
    %c0_i32_1 = arith.constant 0 : i32
    %c0_i32_2 = arith.constant 0 : i32
    return %c0_i32, %c0_i32_0, %c0_i32_1 : i32, i32, i32
  }
  func.func @transform_8(%arg0: i32) -> (i32, i32, i32) {
    %c0_i32 = arith.constant 0 : i32
    %c0_i32_0 = arith.constant 0 : i32
    %c0_i32_1 = arith.constant 0 : i32
    %c0_i32_2 = arith.constant 0 : i32
    return %c0_i32, %c0_i32_0, %c0_i32_1 : i32, i32, i32
  }
  func.func @transform_9(%arg0: i32) -> (i32, i32) {
    %c0_i32 = arith.constant 0 : i32
    %c0_i32_0 = arith.constant 0 : i32
    %c0_i32_1 = arith.constant 0 : i32
    return %c0_i32, %c0_i32_0 : i32, i32
  }
  func.func @transform_10(%arg0: i32) -> (i32, i32) {
    %c0_i32 = arith.constant 0 : i32
    %c0_i32_0 = arith.constant 0 : i32
    %c0_i32_1 = arith.constant 0 : i32
    return %c0_i32, %c0_i32_0 : i32, i32
  }
  func.func @transform_11(%arg0: i32) -> (i32, i32, i32) {
    %c0_i32 = arith.constant 0 : i32
    %c0_i32_0 = arith.constant 0 : i32
    %c0_i32_1 = arith.constant 0 : i32
    return %arg0, %c0_i32, %c0_i32_0 : i32, i32, i32
  }
}

</mosaic_0001>

<bundles_post_ra>
// kernel: tpu_custom_call.1
= control target key start
LH: loop header
LB: loop body
LE: loop exit
PB: predicated region body
PF: predicated region fallthrough
CT: control target
= control target key end

     0   :  { %16 = vsyncpa [#allocation4], 0  ;;  %s2485_s0 = inlined_call_operand.vmem [shape: bf16[1,64,16], index: 0, kind: input, shape index: {}]   ;;  %s2486_s1 = inlined_call_operand.hbm [shape: bf16[16,32], index: 1, kind: input, shape index: {}]   ;;  %s2487_s2 = inlined_call_operand.hbm [shape: f32[1,32], index: 2, kind: input, shape index: {}]   ;;  %s2488_s3 = inlined_call_operand.vmem [shape: bf16[32,16], index: 3, kind: input, shape index: {}]   ;;  %s2489_s4 = inlined_call_operand.hbm [shape: f32[1,16], index: 4, kind: input, shape index: {}]   ;;  %s2490_s5 = inlined_call_operand.vmem [shape: bf16[16,32], index: 5, kind: input, shape index: {}]   ;;  %s2491_s6 = inlined_call_operand.vmem [shape: bf16[1,32,32], index: 6, kind: input, shape index: {}]   ;;  %s2492_s7 = inlined_call_operand.vmem [shape: f32[2,1,32], index: 7, kind: input, shape index: {}]   ;;  %s2493_s8 = inlined_call_operand.vmem [shape: bf16[2,32,32], index: 8, kind: input, shape index: {}]   ;;  %s2494_s9 = inlined_call_operand.vmem [shape: bf16[32,128], index: 9, kind: input, shape index: {}]   ;;  %s2495_s10 = inlined_call_operand.vmem [shape: f32[1,128], index: 10, kind: input, shape index: {}]   ;;  %s2496_s11 = inlined_call_operand.hbm [shape: bf16[1,64,128], index: 11, kind: output, shape index: {}]  }
   0x1   :  { %17 = vsyncpa [#allocation7], 0 }
   0x2   :  { %18 = vsyncpa [#allocation5], 0  ;;  %s2109_s17 = smov [#allocation6]   ;;  %s2110_s19 = smov [#allocation3]  }
   0x3   :  { %s39_s18 = sshll.u32 %s2109_s17, 4  ;;  %s26_s20 = sshll.u32 %s2110_s19, 4  ;;  %s40_s18 = int_to_ptr.vmem [resolvable:$true] %s39_s18  ;;  %s2178_s20 = int_to_ptr.vmem [resolvable:$true] %s26_s20 }
   0x4   :  { %s2015_s23 = scalar_lea.hbm %s2487_s2, 16 }
   0x5   :  { %p2016_p0 = scmp.ne.s32.totalorder %s2487_s2, %s2015_s23  ;;  %p2019_p1 = scmp.lt.u32.totalorder %s2015_s23, %s2487_s2 }
   0x7   :  { %p2021_p2 = pnand %p2019_p1, %p2016_p0 }
   0x9   :  { %2024 = shalt.err (!%p2021_p2)
}
   0xa   :  { %s2025_s28 = scalar_lea.vmem %s40_s18, 16  ;;  %s2029_s29 = scalar_lea.vmem %s40_s18, 32 }
   0xb   :  { %p2026_p3 = scmp.ne.s32.totalorder %s40_s18, %s2025_s28  ;;  %p2030_p4 = scmp.lt.s32.totalorder %s40_s18, %s40_s18 }
   0xc   :  { %p2031_p5 = scmp.lt.s32.totalorder %s2029_s29, %s2025_s28 }
   0xe   :  { %p2032_p6 = por %p2031_p5, %p2030_p4 }
  0x10   :  { %p2033_p7 = pnand %p2032_p6, %p2026_p3 }
  0x12   :  { %2036 = shalt.err (!%p2033_p7)
}
  0x13   :  { %42 = dma.hbm_to_vmem [thread:$0]  %s2487_s2, 16, %s40_s18, [#allocation7]  }
  0x14   :  { %s2037_s15 = scalar_lea.hbm %s2486_s1, 128 }
  0x15   :  { %p2038_p8 = scmp.ne.s32.totalorder %s2486_s1, %s2037_s15  ;;  %p2041_p9 = scmp.lt.u32.totalorder %s2037_s15, %s2486_s1 }
  0x17   :  { %p2043_p10 = pnand %p2041_p9, %p2038_p8 }
  0x19   :  { %2046 = shalt.err (!%p2043_p10)
}
  0x1a   :  { %s2047_s22 = scalar_lea.vmem %s2178_s20, 128  ;;  %p2052_p12 = scmp.lt.s32.totalorder %s2178_s20, %s2178_s20 }
  0x1b   :  { %p2048_p11 = scmp.ne.s32.totalorder %s2178_s20, %s2047_s22  ;;  %p2053_p13 = scmp.lt.s32.totalorder %s2047_s22, %s2047_s22 }
  0x1d   :  { %p2054_p0 = por %p2053_p13, %p2052_p12 }
  0x1f   :  { %p2055_p1 = pnand %p2054_p0, %p2048_p11 }
  0x21   :  { %2058 = shalt.err (!%p2055_p1)
}
  0x22   :  { %s2111_s2 = smov 64   ;;  %s2112_s18 = smov 4  }
  0x23   :  { %32 = dma.hbm_to_vmem [thread:$0]  %s2486_s1, 128, %s2178_s20, [#allocation4], %s2111_s2, %s2111_s2, %s2112_s18  }
  0x24   :  { %s2113_s25 = smov [#allocation8]   ;;  %s2059_s29 = scalar_lea.hbm %s2489_s4, 16 }
  0x25   :  { %s51_s26 = sshll.u32 %s2113_s25, 4  ;;  %p2060_p2 = scmp.ne.s32.totalorder %s2489_s4, %s2059_s29  ;;  %s52_s26 = int_to_ptr.vmem [resolvable:$true] %s51_s26 }
  0x26   :  { %p2063_p3 = scmp.lt.u32.totalorder %s2059_s29, %s2489_s4 }
  0x28   :  { %p2065_p4 = pnand %p2063_p3, %p2060_p2 }
  0x2a   :  { %2068 = shalt.err (!%p2065_p4)
}
  0x2b   :  { %s2069_s15 = scalar_lea.vmem %s52_s26, 16  ;;  %s2073_s1 = scalar_lea.vmem %s52_s26, 32 }
  0x2c   :  { %p2070_p5 = scmp.ne.s32.totalorder %s52_s26, %s2069_s15  ;;  %p2074_p6 = scmp.lt.s32.totalorder %s52_s26, %s52_s26 }
  0x2d   :  { %p2075_p7 = scmp.lt.s32.totalorder %s2073_s1, %s2069_s15 }
  0x2f   :  { %p2076_p8 = por %p2075_p7, %p2074_p6 }
  0x31   :  { %p2077_p9 = pnand %p2076_p8, %p2070_p5 }
  0x33   :  { %2080 = shalt.err (!%p2077_p9)
}
  0x34   :  { %54 = dma.hbm_to_vmem [thread:$0]  %s2489_s4, 16, %s52_s26, [#allocation7]  }
  0x35   :  { %2103 = dma.done.wait [#allocation4], 128  }
  0x36   :  { %2104 = vsyncadd [#allocation4], 4294967168 }
  0x37   :  { %2105 = dma.done.wait [#allocation7], 32  }
  0x38   :  { %2106 = vsyncadd [#allocation7], 4294967264  ;;  %v1935_v0 = vld [vmem:[#allocation3] sm:$0xff]   ;;  %vm120_vm0 = vcmask 130048   ;;  %v1937_v2 = vld [vmem:[%s2485_s0 + $0x8] sm:$0xff]   ;;  %vm233_vm1 = vcmask 261120  }
  0x39   :  { %v1936_v1 = vld [vmem:[%s2485_s0] sm:$0xff]   ;;  %1740 = vmatprep.subr.bf16.mxu0 %v1935_v0  ;;  %1924 = vmatprep.subr.bf16.mxu1 %v1935_v0  ;;  %v1938_v3 = vld [vmem:[%s2485_s0 + $0x10] sm:$0xff]   ;;  %v1939_v4 = vld [vmem:[%s2485_s0 + $0x18] sm:$0xff]   ;;  %v2114_v38 = vmov 0.0   ;;  %vm2115_vm2 = vmmov 0   ;;  %v2116_v40 = vmov 0  }
  0x3a   :  { %1741 = vmatpush3.bf16.msra.mxu0 %v1935_v0  ;;  %1742 = vmatprep.mubr.msk.bf16.mxu0 %vm120_vm0, %v1936_v1  ;;  %v1940_v5 = vld [vmem:[%s2488_s3] sm:$0xff]   ;;  %v1941_v6 = vld [vmem:[%s2488_s3 + $0x8] sm:$0xff]  }
  0x3b   :  { %1925 = vmatpush3.bf16.msra.mxu1 %v1935_v0  ;;  %1746 = vmatprep.mubr.msk.bf16.mxu1 %vm120_vm0, %v1938_v3  ;;  %v1557_v7 = vld [vmem:[#allocation6] ss:$0 sm:$0xff]  ;;  %v1942_v36 = vld [vmem:[%s2490_s5] sm:$0xff]   ;;  %v1567_v42 = vld [vmem:[#allocation8] ss:$0 sm:$0xff] }
  0x3c   :  { %1750 = vmatprep.subr.bf16.mxu1 %v1940_v5  ;;  %1762 = vmatprep.subr.bf16.mxu0 %v1942_v36  ;;  %v2256_v37 = vld [vmem:[%s2493_s8] sm:$0xff]   ;;  %v2265_v39 = vld [vmem:[%s2493_s8 + $0x8] sm:$0xff]  }
  0x3d   :  { %1743 = vmatmul.mubr.msk.bf16.vlgmr.msra.gmra.mrb[0].mxu0 %vm120_vm0, %v1937_v2  ;;  %v1574_v2 = vld [vmem:[%s2492_s7] ss:$0 sm:$0xff] }
  0x3e   :  { %1747 = vmatmul.mubr.msk.bf16.vlgmr.msra.gmra.mrb[0].mxu1 %vm120_vm0, %v1939_v4  ;;  %1763 = vmatpush3.bf16.msra.mxu0 %v1942_v36 }
  0x3f   :  { %1751 = vmatpush3.bf16.msra.mxu1 %v1940_v5  ;;  %1788 = vmatprep.subr.bf16.mxu0 %v2114_v38 }
  0x40   :  { %1752 = vmatprep.subr.bf16.mxu1 %v1941_v6 }
  0x43   :  { %1753 = vmatpush3.bf16.msra.mxu1 %v1941_v6 }
  0x44   :  { %1772 = vmatprep.subr.bf16.mxu1 %v2114_v38 }
 0x110   :  { %v1744_v8 = vpop.f32.mrb[0].mxu0 }
 0x111   :  { %v176_v9 = vadd.f32 %v1744_v8, %v1557_v7  ;;  %v167_v10 = vpop.f32.mrb[1].mxu0  ;;  %v1748_v11 = vpop.f32.mrb[0].mxu1 }
 0x112   :  { %v168_v12 = vadd.f32 %v1557_v7, %v167_v10  ;;  %v1745_v13 = vpop.f32.mrb[2].mxu0  ;;  %v192_v14 = vadd.f32 %v1748_v11, %v1557_v7  ;;  %v183_v15 = vpop.f32.mrb[1].mxu1 }
 0x113   :  { %v179_v16 = vadd.f32 %v1745_v13, %v1557_v7  ;;  %v170_v17 = vpop.f32.mrb[3].mxu0  ;;  %v184_v18 = vadd.f32 %v1557_v7, %v183_v15  ;;  %v1749_v19 = vpop.f32.mrb[2].mxu1  ;;  %v200_v24 = vmax.f32 %v176_v9, 0.0 }
 0x114   :  { %v171_v20 = vadd.f32 %v1557_v7, %v170_v17  ;;  %v204_v21 = vmax.f32 %v192_v14, 0.0  ;;  %v195_v22 = vadd.f32 %v1749_v19, %v1557_v7  ;;  %v186_v23 = vpop.f32.mrb[3].mxu1  ;;  %v198_v28 = vmax.f32 %v168_v12, 0.0 }
 0x115   :  { %v201_v25 = vmax.f32 %v179_v16, 0.0  ;;  %v202_v26 = vmax.f32 %v184_v18, 0.0  ;;  %v187_v27 = vadd.f32 %v1557_v7, %v186_v23 }
 0x116   :  { %v199_v29 = vmax.f32 %v171_v20, 0.0  ;;  %v205_v30 = vmax.f32 %v195_v22, 0.0 }
 0x117   :  { %v207_v31 = vpack.c.bf16 %v201_v25, %v200_v24  ;;  %v203_v32 = vmax.f32 %v187_v27, 0.0 }
 0x118   :  { %v206_v33 = vpack.c.bf16 %v199_v29, %v198_v28  ;;  %v209_v34 = vpack.c.bf16 %v205_v30, %v204_v21 }
 0x119   :  { %v208_v35 = vpack.c.bf16 %v203_v32, %v202_v26 }
 0x11a   :  { %1754 = vmatprep.mubr.msk.bf16.mxu1 %vm233_vm1, %v206_v33 }
 0x11b   :  { %1755 = vmatmul.mubr.msk.bf16.vlgmr.msra.gmra.mrb[4].mxu1 %vm233_vm1, %v207_v31 }
 0x11c   :  { %1758 = vmatprep.mubr.msk.bf16.mxu1 %vm233_vm1, %v208_v35  ;;  %1773 = vmatpush3.bf16.msra.mxu1 %v2256_v37 }
 0x11d   :  { %1774 = vmatprep.subr.bf16.mxu1 %v2114_v38 }
 0x120   :  { %1775 = vmatpush3.bf16.msra.mxu1 %v2265_v39 }
 0x121   :  { %1780 = vmatprep.subr.bf16.mxu1 %v2114_v38 }
 0x123   :  { %1759 = vmatmul.mubr.msk.bf16.gmra.mrb[8].mxu1 %vm233_vm1, %v209_v34 }
 0x124   :  { %1776 = vmatprep.mubr.msk.bf16.mxu1 %vm2115_vm2, %v2114_v38 }
 0x12b   :  { %1777 = vmatmul.mubr.bf16.vlgmr.msra.gmra.mrb[12].mxu1 %v2116_v40 }
 0x12c   :  { %1781 = vmatpush3.bf16.msra.mxu1 %v2256_v37  ;;  %1784 = vmatprep.mubr.msk.bf16.mxu1 %vm2115_vm2, %v2114_v38 }
 0x12d   :  { %1782 = vmatprep.subr.bf16.mxu1 %v2114_v38 }
 0x130   :  { %1783 = vmatpush3.bf16.msra.mxu1 %v2265_v39 }
 0x131   :  { %1796 = vmatprep.subr.bf16.mxu1 %v2114_v38 }
 0x1ee   :  { %v1756_v41 = vpop.f32.mrb[4].mxu1 }
 0x1ef   :  { %v280_v43 = vpop.f32.mrb[5].mxu1  ;;  %v289_v45 = vadd.f32 %v1756_v41, %v1567_v42 }
 0x1f0   :  { %v1757_v44 = vpop.f32.mrb[6].mxu1  ;;  %v281_v48 = vadd.f32 %v1567_v42, %v280_v43 }
 0x1f1   :  { %v292_v46 = vadd.f32 %v1757_v44, %v1567_v42  ;;  %v283_v47 = vpop.f32.mrb[7].mxu1 }
 0x1f2   :  { %v284_v49 = vadd.f32 %v1567_v42, %v283_v47 }
 0x1f3   :  { %v312_v50 = vpack.c.bf16 %v292_v46, %v289_v45 }
 0x1f4   :  { %v311_v51 = vpack.c.bf16 %v284_v49, %v281_v48 }
 0x1f6   :  { %1764 = vmatprep.mubr.msk.bf16.mxu0 %vm120_vm0, %v311_v51  ;;  %v1760_v52 = vpop.f32.mrb[8].mxu1 }
 0x1f7   :  { %1765 = vmatmul.mubr.msk.bf16.vlgmr.msra.gmra.mrb[4].mxu0 %vm120_vm0, %v312_v50  ;;  %v305_v53 = vadd.f32 %v1760_v52, %v1567_v42  ;;  %v296_v54 = vpop.f32.mrb[9].mxu1 }
 0x1f8   :  { %v297_v55 = vadd.f32 %v1567_v42, %v296_v54  ;;  %v1761_v56 = vpop.f32.mrb[10].mxu1  ;;  %1789 = vmatpush3.bf16.msra.mxu0 %v2256_v37 }
 0x1f9   :  { %v308_v57 = vadd.f32 %v1761_v56, %v1567_v42  ;;  %v299_v58 = vpop.f32.mrb[11].mxu1  ;;  %1790 = vmatprep.subr.bf16.mxu0 %v2114_v38 }
 0x1fa   :  { %v300_v59 = vadd.f32 %v1567_v42, %v299_v58 }
 0x1fb   :  { %v314_v60 = vpack.c.bf16 %v308_v57, %v305_v53 }
 0x1fc   :  { %v313_v61 = vpack.c.bf16 %v300_v59, %v297_v55  ;;  %1791 = vmatpush3.bf16.msra.mxu0 %v2265_v39  ;;  %v1945_v59 = vld [vmem:[%s2491_s6] sm:$0xff]  }
 0x1fd   :  { %1804 = vmatprep.subr.bf16.mxu0 %v2114_v38 }
 0x1fe   :  { %1768 = vmatprep.mubr.msk.bf16.mxu0 %vm120_vm0, %v313_v61  ;;  %v469_v62 = vpop.f32.mrb[12].mxu1 }
 0x1ff   :  { %1769 = vmatmul.mubr.msk.bf16.gmra.mrb[8].mxu0 %vm120_vm0, %v314_v60  ;;  %v1778_v63 = vpop.f32.mrb[13].mxu1 }
 0x200   :  { %1792 = vmatprep.mubr.msk.bf16.mxu0 %vm2115_vm2, %v2114_v38  ;;  %v472_v0 = vpop.f32.mrb[14].mxu1 }
 0x201   :  { %v1779_v1 = vpop.f32.mrb[15].mxu1 }
 0x2ca   :  { %v1766_v3 = vpop.f32.mrb[4].mxu0 }
 0x2cb   :  { %v385_v4 = vadd.f32 %v1766_v3, %v1574_v2  ;;  %v376_v5 = vpop.f32.mrb[5].mxu0 }
 0x2cc   :  { %v377_v6 = vadd.f32 %v1574_v2, %v376_v5  ;;  %v1767_v7 = vpop.f32.mrb[6].mxu0 }
 0x2cd   :  { %409 = vst.msk [vmem:[#allocation2 + $0x10] sm:$0xff] %vm233_vm1, %v385_v4  ;;  %v388_v8 = vadd.f32 %v1767_v7, %v1574_v2  ;;  %v379_v9 = vpop.f32.mrb[7].mxu0  ;;  %v1946_v4 = vld [vmem:[%s2491_s6 + $0x8] sm:$0xff]  }
 0x2ce   :  { %407 = vst.msk [vmem:[#allocation2] sm:$0xff] %vm233_vm1, %v377_v6  ;;  %v380_v10 = vadd.f32 %v1574_v2, %v379_v9 }
 0x2cf   :  { %410 = vst.msk [vmem:[#allocation2 + $0x18] sm:$0xff] %vm233_vm1, %v388_v8 }
 0x2d0   :  { %408 = vst.msk [vmem:[#allocation2 + $0x8] sm:$0xff] %vm233_vm1, %v380_v10 }
 0x2d2   :  { %v1770_v11 = vpop.f32.mrb[8].mxu0 }
 0x2d3   :  { %v401_v12 = vadd.f32 %v1770_v11, %v1574_v2  ;;  %v392_v13 = vpop.f32.mrb[9].mxu0 }
 0x2d4   :  { %v393_v14 = vadd.f32 %v1574_v2, %v392_v13  ;;  %v1771_v15 = vpop.f32.mrb[10].mxu0  ;;  %v528_v31 = vld [vmem:[#allocation2 + $0x10] sm:$0xff]  ;;  %v2360_v13 = vld [vmem:[%s2493_s8 + $0x18] sm:$0xff]  }
 0x2d5   :  { %v419_v16 = vld [vmem:[#allocation2] sm:$0xff]  ;;  %413 = vst.msk [vmem:[#allocation2 + $0x30] sm:$0xff] %vm233_vm1, %v401_v12  ;;  %v404_v17 = vadd.f32 %v1771_v15, %v1574_v2  ;;  %v395_v18 = vpop.f32.mrb[11].mxu0  ;;  %v2353_v12 = vld [vmem:[%s2493_s8 + $0x10] sm:$0xff]  }
 0x2d6   :  { %v475_v19 = vadd.f32 %v469_v62, %v419_v16  ;;  %411 = vst.msk [vmem:[#allocation2 + $0x20] sm:$0xff] %vm233_vm1, %v393_v14  ;;  %v396_v20 = vadd.f32 %v1574_v2, %v395_v18  ;;  %v577_v43 = vld [vmem:[#allocation2 + $0x18] sm:$0xff] }
 0x2d7   :  { %414 = vst.msk [vmem:[#allocation2 + $0x38] sm:$0xff] %vm233_vm1, %v404_v17  ;;  %v479_v23 = vld [vmem:[#allocation2 + $0x8] sm:$0xff] }
 0x2d8   :  { %1951 = vtanh.f32 %v475_v19  ;;  %412 = vst.msk [vmem:[#allocation2 + $0x28] sm:$0xff] %vm233_vm1, %v396_v20  ;;  %v2367_v20 = vld [vmem:[%s2492_s7 + $0x1] ss:$0 sm:$0xff] }
 0x2dc   :  { %v724_v14 = vld [vmem:[#allocation2 + $0x30] sm:$0xff] }
 0x2dd   :  { %v626_v51 = vld [vmem:[#allocation2 + $0x20] sm:$0xff] }
 0x2df   :  { %v675_v60 = vld [vmem:[#allocation2 + $0x28] sm:$0xff] }
 0x2e2   :  { %v1952_v21 = vpop.eup %1951 }
 0x2e3   :  { %477 = vst.msk [vmem:[#allocation2] sm:$0xff] %vm233_vm1, %v1952_v21  ;;  %v480_v22 = vpack.c.bf16 %v1952_v21, %v1952_v21 }
 0x2e5   :  { %1785 = vmatmul.mubr.msk.bf16.vlgmr.msra.gmra.mrb[16].mxu1 %vm233_vm1, %v480_v22 }
 0x2e6   :  { %1797 = vmatpush3.bf16.msra.mxu1 %v2256_v37  ;;  %1800 = vmatprep.mubr.msk.bf16.mxu1 %vm2115_vm2, %v2114_v38 }
 0x2e7   :  { %1798 = vmatprep.subr.bf16.mxu1 %v2114_v38 }
 0x2ea   :  { %1799 = vmatpush3.bf16.msra.mxu1 %v2265_v39 }
 0x2eb   :  { %1812 = vmatprep.subr.bf16.mxu1 %v2114_v38 }
 0x3b8   :  { %v518_v24 = vpop.f32.mrb[16].mxu1 }
 0x3b9   :  { %v524_v25 = vadd.f32 %v518_v24, %v479_v23  ;;  %v1786_v26 = vpop.f32.mrb[17].mxu1 }
 0x3ba   :  { %v521_v27 = vpop.f32.mrb[18].mxu1 }
 0x3bb   :  { %1953 = vtanh.f32 %v524_v25  ;;  %v1787_v28 = vpop.f32.mrb[19].mxu1 }
 0x3c5   :  { %v1954_v29 = vpop.eup %1953 }
 0x3c6   :  { %526 = vst.msk [vmem:[#allocation2 + $0x8] sm:$0xff] %vm233_vm1, %v1954_v29  ;;  %v529_v30 = vpack.c.bf16 %v1954_v29, %v1954_v29 }
 0x3c8   :  { %1793 = vmatmul.mubr.msk.bf16.vlgmr.msra.gmra.mrb[12].mxu0 %vm233_vm1, %v529_v30 }
 0x3c9   :  { %1805 = vmatpush3.bf16.msra.mxu0 %v2256_v37  ;;  %1808 = vmatprep.mubr.msk.bf16.mxu0 %vm2115_vm2, %v2114_v38 }
 0x3ca   :  { %1806 = vmatprep.subr.bf16.mxu0 %v2114_v38 }
 0x3cd   :  { %1807 = vmatpush3.bf16.msra.mxu0 %v2265_v39  ;;  %v822_v1 = vld [vmem:[#allocation2 + $0x8] sm:$0xff] }
 0x3ce   :  { %1820 = vmatprep.subr.bf16.mxu0 %v2114_v38 }
 0x49b   :  { %v567_v32 = vpop.f32.mrb[12].mxu0 }
 0x49c   :  { %v573_v33 = vadd.f32 %v567_v32, %v528_v31  ;;  %v1794_v34 = vpop.f32.mrb[13].mxu0  ;;  %v773_v31 = vld [vmem:[#allocation2 + $0x38] sm:$0xff] }
 0x49d   :  { %v570_v35 = vpop.f32.mrb[14].mxu0 }
 0x49e   :  { %1955 = vtanh.f32 %v573_v33  ;;  %v1795_v36 = vpop.f32.mrb[15].mxu0 }
 0x4a8   :  { %v1956_v41 = vpop.eup %1955 }
 0x4a9   :  { %575 = vst.msk [vmem:[#allocation2 + $0x10] sm:$0xff] %vm233_vm1, %v1956_v41  ;;  %v578_v42 = vpack.c.bf16 %v1956_v41, %v1956_v41 }
 0x4ab   :  { %1801 = vmatmul.mubr.msk.bf16.vlgmr.msra.gmra.mrb[20].mxu1 %vm233_vm1, %v578_v42 }
 0x4ac   :  { %1813 = vmatpush3.bf16.msra.mxu1 %v2256_v37  ;;  %1816 = vmatprep.mubr.msk.bf16.mxu1 %vm2115_vm2, %v2114_v38 }
 0x4ad   :  { %1814 = vmatprep.subr.bf16.mxu1 %v2114_v38 }
 0x4b0   :  { %1815 = vmatpush3.bf16.msra.mxu1 %v2265_v39  ;;  %v823_v7 = vld [vmem:[#allocation2 + $0x10] sm:$0xff] }
 0x4b1   :  { %1828 = vmatprep.subr.bf16.mxu1 %v2114_v38 }
 0x57e   :  { %v616_v44 = vpop.f32.mrb[20].mxu1 }
 0x57f   :  { %v622_v45 = vadd.f32 %v616_v44, %v577_v43  ;;  %v1802_v46 = vpop.f32.mrb[21].mxu1 }
 0x580   :  { %v619_v47 = vpop.f32.mrb[22].mxu1 }
 0x581   :  { %1957 = vtanh.f32 %v622_v45  ;;  %v1803_v48 = vpop.f32.mrb[23].mxu1 }
 0x58b   :  { %v1958_v49 = vpop.eup %1957 }
 0x58c   :  { %624 = vst.msk [vmem:[#allocation2 + $0x18] sm:$0xff] %vm233_vm1, %v1958_v49  ;;  %v627_v50 = vpack.c.bf16 %v1958_v49, %v1958_v49 }
 0x58e   :  { %1809 = vmatmul.mubr.msk.bf16.vlgmr.msra.gmra.mrb[16].mxu0 %vm233_vm1, %v627_v50 }
 0x58f   :  { %1821 = vmatpush3.bf16.msra.mxu0 %v2256_v37  ;;  %1824 = vmatprep.mubr.msk.bf16.mxu0 %vm2115_vm2, %v2114_v38 }
 0x590   :  { %1822 = vmatprep.subr.bf16.mxu0 %v2114_v38 }
 0x593   :  { %1823 = vmatpush3.bf16.msra.mxu0 %v2265_v39  ;;  %v824_v6 = vld [vmem:[#allocation2 + $0x18] sm:$0xff] }
 0x594   :  { %1836 = vmatprep.subr.bf16.mxu0 %v1945_v59  ;;  %v830_v10 = vpack.c.bf16 %v824_v6, %v823_v7 }
 0x661   :  { %v665_v52 = vpop.f32.mrb[16].mxu0 }
 0x662   :  { %v671_v53 = vadd.f32 %v665_v52, %v626_v51  ;;  %v1810_v54 = vpop.f32.mrb[17].mxu0 }
 0x663   :  { %v668_v55 = vpop.f32.mrb[18].mxu0 }
 0x664   :  { %1959 = vtanh.f32 %v671_v53  ;;  %v1811_v56 = vpop.f32.mrb[19].mxu0 }
 0x66e   :  { %v1960_v57 = vpop.eup %1959 }
 0x66f   :  { %673 = vst.msk [vmem:[#allocation2 + $0x20] sm:$0xff] %vm233_vm1, %v1960_v57  ;;  %v676_v58 = vpack.c.bf16 %v1960_v57, %v1960_v57 }
 0x671   :  { %1817 = vmatmul.mubr.msk.bf16.vlgmr.msra.gmra.mrb[24].mxu1 %vm233_vm1, %v676_v58 }
 0x672   :  { %1829 = vmatpush3.bf16.msra.mxu1 %v2256_v37  ;;  %1832 = vmatprep.mubr.msk.bf16.mxu1 %vm2115_vm2, %v2114_v38 }
 0x673   :  { %1830 = vmatprep.subr.bf16.mxu1 %v2114_v38 }
 0x676   :  { %1831 = vmatpush3.bf16.msra.mxu1 %v2265_v39  ;;  %v821_v39 = vld [vmem:[#allocation2] sm:$0xff] }
 0x677   :  { %1848 = vmatprep.subr.bf16.mxu1 %v2114_v38  ;;  %v829_v5 = vpack.c.bf16 %v822_v1, %v821_v39  ;;  %v825_v8 = vld [vmem:[#allocation2 + $0x20] sm:$0xff] }
 0x744   :  { %v714_v61 = vpop.f32.mrb[24].mxu1 }
 0x745   :  { %v720_v62 = vadd.f32 %v714_v61, %v675_v60  ;;  %v1818_v63 = vpop.f32.mrb[25].mxu1 }
 0x746   :  { %v717_v0 = vpop.f32.mrb[26].mxu1 }
 0x747   :  { %1961 = vtanh.f32 %v720_v62  ;;  %v1819_v37 = vpop.f32.mrb[27].mxu1 }
 0x751   :  { %v1962_v2 = vpop.eup %1961 }
 0x752   :  { %722 = vst.msk [vmem:[#allocation2 + $0x28] sm:$0xff] %vm233_vm1, %v1962_v2  ;;  %v725_v3 = vpack.c.bf16 %v1962_v2, %v1962_v2 }
 0x754   :  { %1825 = vmatmul.mubr.msk.bf16.vlgmr.msra.gmra.mrb[20].mxu0 %vm233_vm1, %v725_v3 }
 0x755   :  { %1837 = vmatpush3.bf16.msra.mxu0 %v1945_v59  ;;  %1840 = vmatprep.mubr.msk.bf16.mxu0 %vm233_vm1, %v829_v5 }
 0x756   :  { %1838 = vmatprep.subr.bf16.mxu0 %v1946_v4 }
 0x759   :  { %1839 = vmatpush3.bf16.msra.mxu0 %v1946_v4  ;;  %v826_v9 = vld [vmem:[#allocation2 + $0x28] sm:$0xff] }
 0x75a   :  { %v831_v11 = vpack.c.bf16 %v826_v9, %v825_v8  ;;  %1864 = vmatprep.subr.bf16.mxu0 %v2114_v38 }
 0x75c   :  { %1841 = vmatmul.mubr.msk.bf16.vlgmr.msra.gmra.mrb[24].mxu0 %vm233_vm1, %v830_v10 }
 0x75d   :  { %1844 = vmatprep.mubr.msk.bf16.mxu0 %vm233_vm1, %v831_v11  ;;  %1865 = vmatpush3.bf16.msra.mxu0 %v2353_v12 }
 0x75e   :  { %1866 = vmatprep.subr.bf16.mxu0 %v2114_v38 }
 0x761   :  { %1867 = vmatpush3.bf16.msra.mxu0 %v2360_v13 }
 0x762   :  { %1880 = vmatprep.subr.bf16.mxu0 %v2114_v38 }
 0x827   :  { %v763_v15 = vpop.f32.mrb[20].mxu0 }
 0x828   :  { %v769_v16 = vadd.f32 %v763_v15, %v724_v14  ;;  %v1826_v17 = vpop.f32.mrb[21].mxu0 }
 0x829   :  { %v766_v18 = vpop.f32.mrb[22].mxu0 }
 0x82a   :  { %1963 = vtanh.f32 %v769_v16  ;;  %v1827_v19 = vpop.f32.mrb[23].mxu0 }
 0x82f   :  { %v1842_v21 = vpop.f32.mrb[24].mxu0 }
 0x830   :  { %v912_v22 = vadd.f32 %v1842_v21, %v2367_v20  ;;  %v903_v23 = vpop.f32.mrb[25].mxu0 }
 0x831   :  { %v904_v24 = vadd.f32 %v2367_v20, %v903_v23  ;;  %v1843_v25 = vpop.f32.mrb[26].mxu0 }
 0x832   :  { %936 = vst.msk [vmem:[#allocation2 + $0x10] sm:$0xff] %vm233_vm1, %v912_v22  ;;  %v915_v26 = vadd.f32 %v1843_v25, %v2367_v20  ;;  %v906_v27 = vpop.f32.mrb[27].mxu0 }
 0x833   :  { %934 = vst.msk [vmem:[#allocation2] sm:$0xff] %vm233_vm1, %v904_v24  ;;  %v907_v28 = vadd.f32 %v2367_v20, %v906_v27 }
 0x834   :  { %v1964_v29 = vpop.eup %1963  ;;  %937 = vst.msk [vmem:[#allocation2 + $0x18] sm:$0xff] %vm233_vm1, %v915_v26 }
 0x835   :  { %771 = vst.msk [vmem:[#allocation2 + $0x30] sm:$0xff] %vm233_vm1, %v1964_v29  ;;  %935 = vst.msk [vmem:[#allocation2 + $0x8] sm:$0xff] %vm233_vm1, %v907_v28  ;;  %v774_v30 = vpack.c.bf16 %v1964_v29, %v1964_v29  ;;  %v1949_v28 = vld [vmem:[%s2494_s9] sm:$0xff]  }
 0x837   :  { %1833 = vmatmul.mubr.msk.bf16.vlgmr.msra.gmra.mrb[28].mxu1 %vm233_vm1, %v774_v30 }
 0x838   :  { %1849 = vmatpush3.bf16.msra.mxu1 %v2353_v12  ;;  %1852 = vmatprep.mubr.msk.bf16.mxu1 %vm2115_vm2, %v2114_v38 }
 0x839   :  { %1850 = vmatprep.subr.bf16.mxu1 %v2114_v38  ;;  %v1051_v3 = vld [vmem:[#allocation2 + $0x10] sm:$0xff] }
 0x83a   :  { %v947_v41 = vld [vmem:[#allocation2] sm:$0xff] }
 0x83b   :  { %v1099_v10 = vld [vmem:[#allocation2 + $0x18] sm:$0xff] }
 0x83c   :  { %1851 = vmatpush3.bf16.msra.mxu1 %v2360_v13  ;;  %v827_v48 = vld [vmem:[#allocation2 + $0x30] sm:$0xff]  ;;  %v1003_v53 = vld [vmem:[#allocation2 + $0x8] sm:$0xff] }
 0x83d   :  { %1856 = vmatprep.subr.bf16.mxu1 %v2114_v38 }
 0x83f   :  { %1853 = vmatmul.mubr.bf16.vlgmr.msra.gmra.mrb[32].mxu1 %v2116_v40 }
 0x840   :  { %1857 = vmatpush3.bf16.msra.mxu1 %v2353_v12  ;;  %1860 = vmatprep.mubr.msk.bf16.mxu1 %vm2115_vm2, %v2114_v38 }
 0x841   :  { %1858 = vmatprep.subr.bf16.mxu1 %v2114_v38 }
 0x844   :  { %1859 = vmatpush3.bf16.msra.mxu1 %v2360_v13 }
 0x845   :  { %1872 = vmatprep.subr.bf16.mxu1 %v2114_v38 }
 0x90a   :  { %v812_v32 = vpop.f32.mrb[28].mxu1 }
 0x90b   :  { %v818_v33 = vadd.f32 %v812_v32, %v773_v31  ;;  %v1834_v34 = vpop.f32.mrb[29].mxu1 }
 0x90c   :  { %v815_v35 = vpop.f32.mrb[30].mxu1 }
 0x90d   :  { %1965 = vtanh.f32 %v818_v33  ;;  %v1835_v36 = vpop.f32.mrb[31].mxu1 }
 0x912   :  { %v994_v40 = vpop.f32.mrb[32].mxu1 }
 0x913   :  { %v1000_v42 = vadd.f32 %v994_v40, %v947_v41  ;;  %v1854_v43 = vpop.f32.mrb[33].mxu1 }
 0x914   :  { %v997_v44 = vpop.f32.mrb[34].mxu1 }
 0x915   :  { %1967 = vtanh.f32 %v1000_v42  ;;  %v1855_v45 = vpop.f32.mrb[35].mxu1 }
 0x917   :  { %v1966_v46 = vpop.eup %1965 }
 0x918   :  { %820 = vst.msk [vmem:[#allocation2 + $0x38] sm:$0xff] %vm233_vm1, %v1966_v46 }
 0x91f   :  { %v1968_v47 = vpop.eup %1967  ;;  %v828_v49 = vld [vmem:[#allocation2 + $0x38] sm:$0xff] }
 0x920   :  { %1002 = vst.msk [vmem:[#allocation2] sm:$0xff] %vm233_vm1, %v1968_v47  ;;  %v832_v50 = vpack.c.bf16 %v828_v49, %v827_v48  ;;  %v1004_v51 = vpack.c.bf16 %v1968_v47, %v1968_v47 }
 0x922   :  { %1845 = vmatmul.mubr.msk.bf16.gmra.mrb[28].mxu0 %vm233_vm1, %v832_v50  ;;  %1861 = vmatmul.mubr.msk.bf16.vlgmr.msra.gmra.mrb[36].mxu1 %vm233_vm1, %v1004_v51 }
 0x923   :  { %1868 = vmatprep.mubr.msk.bf16.mxu0 %vm2115_vm2, %v2114_v38  ;;  %1873 = vmatpush3.bf16.msra.mxu1 %v2353_v12 }
 0x924   :  { %1874 = vmatprep.subr.bf16.mxu1 %v2114_v38  ;;  %1876 = vmatprep.mubr.msk.bf16.mxu1 %vm2115_vm2, %v2114_v38 }
 0x927   :  { %1875 = vmatpush3.bf16.msra.mxu1 %v2360_v13 }
 0x928   :  { %1888 = vmatprep.subr.bf16.mxu1 %v2114_v38 }
 0x9f5   :  { %v1846_v52 = vpop.f32.mrb[28].mxu0  ;;  %v1042_v54 = vpop.f32.mrb[36].mxu1 }
 0x9f6   :  { %v928_v55 = vadd.f32 %v1846_v52, %v2367_v20  ;;  %v1048_v56 = vadd.f32 %v1042_v54, %v1003_v53  ;;  %v919_v57 = vpop.f32.mrb[29].mxu0  ;;  %v1862_v58 = vpop.f32.mrb[37].mxu1  ;;  %v2456_v53 = vld [vmem:[%s2495_s10] ss:$0 sm:$0xff]  ;;  %s2117_s10 = smov [#allocation9]  }
 0x9f7   :  { %v920_v59 = vadd.f32 %v2367_v20, %v919_v57  ;;  %v1847_v60 = vpop.f32.mrb[30].mxu0  ;;  %v1045_v61 = vpop.f32.mrb[38].mxu1  ;;  %s1544_s27 = sshll.u32 %s2117_s10, 4  ;;  %s1545_s27 = int_to_ptr.vmem [resolvable:$true] %s1544_s27 }
 0x9f8   :  { %940 = vst.msk [vmem:[#allocation2 + $0x30] sm:$0xff] %vm233_vm1, %v928_v55  ;;  %1969 = vtanh.f32 %v1048_v56  ;;  %v931_v62 = vadd.f32 %v1847_v60, %v2367_v20  ;;  %v922_v63 = vpop.f32.mrb[31].mxu0  ;;  %v1863_v0 = vpop.f32.mrb[39].mxu1  ;;  %s2081_s28 = scalar_lea.vmem %s1545_s27, 512  ;;  %p2086_p11 = scmp.lt.s32.totalorder %s1545_s27, %s1545_s27 }
 0x9f9   :  { %938 = vst.msk [vmem:[#allocation2 + $0x20] sm:$0xff] %vm233_vm1, %v920_v59  ;;  %v923_v37 = vadd.f32 %v2367_v20, %v922_v63  ;;  %p2082_p10 = scmp.ne.s32.totalorder %s1545_s27, %s2081_s28  ;;  %p2087_p12 = scmp.lt.s32.totalorder %s2081_s28, %s2081_s28 }
 0x9fa   :  { %941 = vst.msk [vmem:[#allocation2 + $0x38] sm:$0xff] %vm233_vm1, %v931_v62 }
 0x9fb   :  { %939 = vst.msk [vmem:[#allocation2 + $0x28] sm:$0xff] %vm233_vm1, %v923_v37  ;;  %p2088_p13 = por %p2087_p12, %p2086_p11 }
 0x9fd   :  { %p2089_p0 = pnand %p2088_p13, %p2082_p10 }
 0x9ff   :  { %v1243_v47 = vld [vmem:[#allocation2 + $0x30] sm:$0xff] }
 0xa00   :  { %v1147_v20 = vld [vmem:[#allocation2 + $0x20] sm:$0xff] }
 0xa02   :  { %v1970_v1 = vpop.eup %1969  ;;  %v1195_v29 = vld [vmem:[#allocation2 + $0x28] sm:$0xff] }
 0xa03   :  { %1050 = vst.msk [vmem:[#allocation2 + $0x8] sm:$0xff] %vm233_vm1, %v1970_v1  ;;  %v1052_v2 = vpack.c.bf16 %v1970_v1, %v1970_v1 }
 0xa05   :  { %1869 = vmatmul.mubr.msk.bf16.vlgmr.msra.gmra.mrb[32].mxu0 %vm233_vm1, %v1052_v2 }
 0xa06   :  { %1881 = vmatpush3.bf16.msra.mxu0 %v2353_v12  ;;  %1884 = vmatprep.mubr.msk.bf16.mxu0 %vm2115_vm2, %v2114_v38 }
 0xa07   :  { %1882 = vmatprep.subr.bf16.mxu0 %v2114_v38 }
 0xa0a   :  { %1883 = vmatpush3.bf16.msra.mxu0 %v2360_v13 }
 0xa0b   :  { %1896 = vmatprep.subr.bf16.mxu0 %v2114_v38 }
 0xad8   :  { %v1090_v39 = vpop.f32.mrb[32].mxu0 }
 0xad9   :  { %v1096_v4 = vadd.f32 %v1090_v39, %v1051_v3  ;;  %v1870_v5 = vpop.f32.mrb[33].mxu0 }
 0xada   :  { %v1093_v6 = vpop.f32.mrb[34].mxu0 }
 0xadb   :  { %1971 = vtanh.f32 %v1096_v4  ;;  %v1871_v7 = vpop.f32.mrb[35].mxu0 }
 0xae5   :  { %v1972_v8 = vpop.eup %1971 }
 0xae6   :  { %1098 = vst.msk [vmem:[#allocation2 + $0x10] sm:$0xff] %vm233_vm1, %v1972_v8  ;;  %v1100_v9 = vpack.c.bf16 %v1972_v8, %v1972_v8 }
 0xae8   :  { %1877 = vmatmul.mubr.msk.bf16.vlgmr.msra.gmra.mrb[40].mxu1 %vm233_vm1, %v1100_v9 }
 0xae9   :  { %1889 = vmatpush3.bf16.msra.mxu1 %v2353_v12  ;;  %1892 = vmatprep.mubr.msk.bf16.mxu1 %vm2115_vm2, %v2114_v38 }
 0xaea   :  { %1890 = vmatprep.subr.bf16.mxu1 %v2114_v38 }
 0xaed   :  { %1891 = vmatpush3.bf16.msra.mxu1 %v2360_v13  ;;  %v1341_v42 = vld [vmem:[#allocation2 + $0x10] sm:$0xff] }
 0xaee   :  { %1904 = vmatprep.subr.bf16.mxu1 %v2114_v38 }
 0xbbb   :  { %v1138_v11 = vpop.f32.mrb[40].mxu1 }
 0xbbc   :  { %v1144_v14 = vadd.f32 %v1138_v11, %v1099_v10  ;;  %v1878_v15 = vpop.f32.mrb[41].mxu1 }
 0xbbd   :  { %v1141_v16 = vpop.f32.mrb[42].mxu1 }
 0xbbe   :  { %1973 = vtanh.f32 %v1144_v14  ;;  %v1879_v17 = vpop.f32.mrb[43].mxu1 }
 0xbc8   :  { %v1974_v18 = vpop.eup %1973 }
 0xbc9   :  { %1146 = vst.msk [vmem:[#allocation2 + $0x18] sm:$0xff] %vm233_vm1, %v1974_v18  ;;  %v1148_v19 = vpack.c.bf16 %v1974_v18, %v1974_v18  ;;  %v1291_v18 = vld [vmem:[#allocation2 + $0x38] sm:$0xff] }
 0xbcb   :  { %1885 = vmatmul.mubr.msk.bf16.vlgmr.msra.gmra.mrb[36].mxu0 %vm233_vm1, %v1148_v19 }
 0xbcc   :  { %1897 = vmatpush3.bf16.msra.mxu0 %v2353_v12  ;;  %1900 = vmatprep.mubr.msk.bf16.mxu0 %vm2115_vm2, %v2114_v38 }
 0xbcd   :  { %1898 = vmatprep.subr.bf16.mxu0 %v2114_v38 }
 0xbd0   :  { %1899 = vmatpush3.bf16.msra.mxu0 %v2360_v13  ;;  %v1342_v40 = vld [vmem:[#allocation2 + $0x18] sm:$0xff] }
 0xbd1   :  { %1912 = vmatprep.subr.bf16.mxu0 %v1949_v28  ;;  %v1348_v45 = vpack.c.bf16 %v1342_v40, %v1341_v42 }
 0xc9e   :  { %v1186_v21 = vpop.f32.mrb[36].mxu0 }
 0xc9f   :  { %v1192_v22 = vadd.f32 %v1186_v21, %v1147_v20  ;;  %v1886_v23 = vpop.f32.mrb[37].mxu0 }
 0xca0   :  { %v1189_v24 = vpop.f32.mrb[38].mxu0 }
 0xca1   :  { %1975 = vtanh.f32 %v1192_v22  ;;  %v1887_v25 = vpop.f32.mrb[39].mxu0 }
 0xcab   :  { %v1976_v26 = vpop.eup %1975 }
 0xcac   :  { %1194 = vst.msk [vmem:[#allocation2 + $0x20] sm:$0xff] %vm233_vm1, %v1976_v26  ;;  %v1196_v27 = vpack.c.bf16 %v1976_v26, %v1976_v26 }
 0xcae   :  { %1893 = vmatmul.mubr.msk.bf16.vlgmr.msra.gmra.mrb[44].mxu1 %vm233_vm1, %v1196_v27 }
 0xcaf   :  { %1905 = vmatpush3.bf16.msra.mxu1 %v2353_v12  ;;  %1908 = vmatprep.mubr.msk.bf16.mxu1 %vm2115_vm2, %v2114_v38  ;;  %v1340_v12 = vld [vmem:[#allocation2 + $0x8] sm:$0xff] }
 0xcb0   :  { %1906 = vmatprep.subr.bf16.mxu1 %v2114_v38  ;;  %v1339_v38 = vld [vmem:[#allocation2] sm:$0xff] }
 0xcb1   :  { %v1347_v41 = vpack.c.bf16 %v1340_v12, %v1339_v38 }
 0xcb3   :  { %1907 = vmatpush3.bf16.msra.mxu1 %v2360_v13  ;;  %v1950_v13 = vld [vmem:[%s2494_s9 + $0x8] sm:$0xff]   ;;  %v1343_v43 = vld [vmem:[#allocation2 + $0x20] sm:$0xff] }
 0xd81   :  { %v1234_v30 = vpop.f32.mrb[44].mxu1 }
 0xd82   :  { %v1240_v31 = vadd.f32 %v1234_v30, %v1195_v29  ;;  %v1894_v32 = vpop.f32.mrb[45].mxu1 }
 0xd83   :  { %v1237_v33 = vpop.f32.mrb[46].mxu1 }
 0xd84   :  { %1977 = vtanh.f32 %v1240_v31  ;;  %v1895_v34 = vpop.f32.mrb[47].mxu1 }
 0xd8e   :  { %v1978_v35 = vpop.eup %1977 }
 0xd8f   :  { %1242 = vst.msk [vmem:[#allocation2 + $0x28] sm:$0xff] %vm233_vm1, %v1978_v35  ;;  %v1244_v36 = vpack.c.bf16 %v1978_v35, %v1978_v35 }
 0xd91   :  { %1901 = vmatmul.mubr.msk.bf16.vlgmr.msra.gmra.mrb[40].mxu0 %vm233_vm1, %v1244_v36 }
 0xd92   :  { %1913 = vmatpush3.bf16.msra.mxu0 %v1949_v28  ;;  %1916 = vmatprep.mubr.msk.bf16.mxu0 %vm233_vm1, %v1347_v41 }
 0xd93   :  { %1914 = vmatprep.subr.bf16.mxu0 %v1950_v13 }
 0xd96   :  { %1915 = vmatpush3.bf16.msra.mxu0 %v1950_v13  ;;  %v1344_v44 = vld [vmem:[#allocation2 + $0x28] sm:$0xff] }
 0xd97   :  { %v1349_v46 = vpack.c.bf16 %v1344_v44, %v1343_v43 }
 0xd99   :  { %1917 = vmatmul.mubr.msk.bf16.vlgmr.msra.gmra.mrb[44].mxu0 %vm233_vm1, %v1348_v45 }
 0xd9a   :  { %1920 = vmatprep.mubr.msk.bf16.mxu0 %vm233_vm1, %v1349_v46 }
 0xe64   :  { %v1282_v48 = vpop.f32.mrb[40].mxu0 }
 0xe65   :  { %v1288_v49 = vadd.f32 %v1282_v48, %v1243_v47  ;;  %v1902_v50 = vpop.f32.mrb[41].mxu0 }
 0xe66   :  { %v1285_v51 = vpop.f32.mrb[42].mxu0 }
 0xe67   :  { %1979 = vtanh.f32 %v1288_v49  ;;  %v1903_v52 = vpop.f32.mrb[43].mxu0 }
 0xe6c   :  { %v1918_v54 = vpop.f32.mrb[44].mxu0 }
 0xe6d   :  { %v1429_v55 = vadd.f32 %v1918_v54, %v2456_v53  ;;  %v1420_v56 = vpop.f32.mrb[45].mxu0 }
 0xe6e   :  { %v1421_v57 = vadd.f32 %v2456_v53, %v1420_v56  ;;  %v1919_v58 = vpop.f32.mrb[46].mxu0 }
 0xe6f   :  { %v1619_v59 = vmul.f32 -1.442695, %v1429_v55  ;;  %v1432_v60 = vadd.f32 %v1919_v58, %v2456_v53  ;;  %v1423_v61 = vpop.f32.mrb[47].mxu0 }
 0xe70   :  { %v1617_v62 = vmul.f32 -1.442695, %v1421_v57  ;;  %v1424_v63 = vadd.f32 %v2456_v53, %v1423_v61 }
 0xe71   :  { %v1980_v0 = vpop.eup %1979  ;;  %1981 = vpow2.f32 %v1619_v59  ;;  %v1620_v37 = vmul.f32 -1.442695, %v1432_v60 }
 0xe72   :  { %1290 = vst.msk [vmem:[#allocation2 + $0x30] sm:$0xff] %vm233_vm1, %v1980_v0  ;;  %1983 = vpow2.f32 %v1617_v62  ;;  %v1618_v1 = vmul.f32 -1.442695, %v1424_v63  ;;  %v1292_v2 = vpack.c.bf16 %v1980_v0, %v1980_v0 }
 0xe73   :  { %1985 = vpow2.f32 %v1620_v37 }
 0xe74   :  { %1987 = vpow2.f32 %v1618_v1  ;;  %1909 = vmatmul.mubr.msk.bf16.vlgmr.msra.gmra.mrb[48].mxu1 %vm233_vm1, %v1292_v2 }
 0xe79   :  { %v1345_v25 = vld [vmem:[#allocation2 + $0x30] sm:$0xff] }
 0xe7b   :  { %v1982_v3 = vpop.eup %1981 }
 0xe7c   :  { %v1984_v39 = vpop.eup %1983  ;;  %v1477_v4 = vadd.f32 1.0, %v1982_v3 }
 0xe7d   :  { %v1986_v5 = vpop.eup %1985  ;;  %v1475_v6 = vadd.f32 1.0, %v1984_v39 }
 0xe7e   :  { %v1988_v7 = vpop.eup %1987  ;;  %1989 = vrcp.f32 %v1477_v4  ;;  %v1478_v8 = vadd.f32 1.0, %v1986_v5 }
 0xe7f   :  { %1991 = vrcp.f32 %v1475_v6  ;;  %v1476_v9 = vadd.f32 1.0, %v1988_v7 }
 0xe80   :  { %1993 = vrcp.f32 %v1478_v8 }
 0xe81   :  { %1995 = vrcp.f32 %v1476_v9 }
 0xe88   :  { %v1990_v10 = vpop.eup %1989 }
 0xe89   :  { %v1992_v11 = vpop.eup %1991 }
 0xe8a   :  { %v1994_v14 = vpop.eup %1993 }
 0xe8b   :  { %v1996_v15 = vpop.eup %1995  ;;  %v1649_v16 = vpack.c.bf16 %v1994_v14, %v1990_v10 }
 0xe8c   :  { %v1644_v17 = vpack.c.bf16 %v1996_v15, %v1992_v11 }
 0xe8d   :  { %1661 = vst [vmem:[#allocation9 + $0x8] sm:$0xff] %v1649_v16  }
 0xe8e   :  { %1645 = vst [vmem:[#allocation9] sm:$0xff] %v1644_v17  }
 0xf47   :  { %v1330_v19 = vpop.f32.mrb[48].mxu1 }
 0xf48   :  { %v1336_v20 = vadd.f32 %v1330_v19, %v1291_v18  ;;  %v1910_v21 = vpop.f32.mrb[49].mxu1 }
 0xf49   :  { %v1333_v22 = vpop.f32.mrb[50].mxu1 }
 0xf4a   :  { %1997 = vtanh.f32 %v1336_v20  ;;  %v1911_v23 = vpop.f32.mrb[51].mxu1 }
 0xf54   :  { %v1998_v24 = vpop.eup %1997 }
 0xf55   :  { %1338 = vst.msk [vmem:[#allocation2 + $0x38] sm:$0xff] %vm233_vm1, %v1998_v24 }
 0xf5c   :  { %v1346_v26 = vld [vmem:[#allocation2 + $0x38] sm:$0xff] }
 0xf5d   :  { %v1350_v27 = vpack.c.bf16 %v1346_v26, %v1345_v25 }
 0xf5f   :  { %1921 = vmatmul.mubr.msk.bf16.gmra.mrb[48].mxu0 %vm233_vm1, %v1350_v27 }
0x1032   :  { %v1922_v28 = vpop.f32.mrb[48].mxu0 }
0x1033   :  { %v1445_v29 = vadd.f32 %v1922_v28, %v2456_v53  ;;  %v1436_v30 = vpop.f32.mrb[49].mxu0 }
0x1034   :  { %v1437_v31 = vadd.f32 %v2456_v53, %v1436_v30  ;;  %v1923_v32 = vpop.f32.mrb[50].mxu0 }
0x1035   :  { %v1623_v33 = vmul.f32 -1.442695, %v1445_v29  ;;  %v1448_v34 = vadd.f32 %v1923_v32, %v2456_v53  ;;  %v1439_v12 = vpop.f32.mrb[51].mxu0 }
0x1036   :  { %v1621_v35 = vmul.f32 -1.442695, %v1437_v31  ;;  %v1440_v36 = vadd.f32 %v2456_v53, %v1439_v12 }
0x1037   :  { %1999 = vpow2.f32 %v1623_v33  ;;  %v1624_v38 = vmul.f32 -1.442695, %v1448_v34 }
0x1038   :  { %2001 = vpow2.f32 %v1621_v35  ;;  %v1622_v13 = vmul.f32 -1.442695, %v1440_v36 }
0x1039   :  { %2003 = vpow2.f32 %v1624_v38 }
0x103a   :  { %2005 = vpow2.f32 %v1622_v13 }
0x1041   :  { %v2000_v41 = vpop.eup %1999 }
0x1042   :  { %v2002_v40 = vpop.eup %2001  ;;  %v1481_v42 = vadd.f32 1.0, %v2000_v41 }
0x1043   :  { %v2004_v43 = vpop.eup %2003  ;;  %v1479_v44 = vadd.f32 1.0, %v2002_v40 }
0x1044   :  { %v2006_v45 = vpop.eup %2005  ;;  %2007 = vrcp.f32 %v1481_v42  ;;  %v1482_v46 = vadd.f32 1.0, %v2004_v43 }
0x1045   :  { %2009 = vrcp.f32 %v1479_v44  ;;  %v1480_v47 = vadd.f32 1.0, %v2006_v45 }
0x1046   :  { %2011 = vrcp.f32 %v1482_v46 }
0x1047   :  { %2013 = vrcp.f32 %v1480_v47 }
0x104e   :  { %v2008_v48 = vpop.eup %2007 }
0x104f   :  { %v2010_v49 = vpop.eup %2009 }
0x1050   :  { %v2012_v50 = vpop.eup %2011 }
0x1051   :  { %v2014_v51 = vpop.eup %2013  ;;  %v1659_v52 = vpack.c.bf16 %v2012_v50, %v2008_v48 }
0x1052   :  { %v1654_v53 = vpack.c.bf16 %v2014_v51, %v2010_v49 }
0x1053   :  { %1663 = vst [vmem:[#allocation9 + $0x18] sm:$0xff] %v1659_v52  }
0x1054   :  { %1662 = vst [vmem:[#allocation9 + $0x10] sm:$0xff] %v1654_v53  }
0x1055   :  { %2092 = shalt.err (!%p2089_p0)
}
0x1056   :  { %s2093_s3 = scalar_lea.hbm %s2496_s11, 512 }
0x1057   :  { %p2094_p1 = scmp.ne.s32.totalorder %s2496_s11, %s2093_s3  ;;  %p2097_p2 = scmp.lt.u32.totalorder %s2093_s3, %s2496_s11 }
0x1059   :  { %p2099_p3 = pnand %p2097_p2, %p2094_p1 }
0x105b   :  { %2102 = shalt.err (!%p2099_p3)
}
0x105c   :  { %1550 = dma.vmem_to_hbm [thread:$0]  %s1545_s27, 512, %s2496_s11, [#allocation5], %s2111_s2, %s2111_s2, %s2112_s18  }
0x105d   :  { %2107 = dma.done.wait [#allocation5], 512  }
0x105e   :  { %2108 = vsyncadd [#allocation5], 4294966784 }
0x105f   :  { %1554 = vsyncpa [#allocation4], 1 }
0x1060   :  { %1555 = vsyncpa [#allocation7], 1 }
0x1061   :  { %1556 = vsyncpa [#allocation5], 1 }

</bundles_post_ra>
